<compile_context>
chip_gen: v7x
topology: tpu7x:2x2x1
jax: 0.10.0
libtpu: 0.0.40
codegen_flags: <defaults>
</compile_context>

<pallas_src>
import math

import jax
import jax.numpy as jnp
import numpy as np
from jax import lax
from jax.experimental import pallas as pl
from jax.experimental.pallas import tpu as pltpu


# ---------------------------------------------------------------------------
# attention kernel: RMSNorm -> QKV proj -> RoPE -> sliding-window flash GQA
#                   -> out proj -> residual
# ---------------------------------------------------------------------------
def _make_attn_kernel(TQ, H, J, Dh, nback, window, eps, cdt):
    G = H // J
    NEG = -1e30  # finite "minus infinity": keeps max()/exp() NaN-free

    def rmsnorm(z, w):
        ms = jnp.mean(z * z, axis=-1, keepdims=True)
        return z * lax.rsqrt(ms + eps) * w

    def rotate_half(z, nh):
        # per-head [z1, z2] -> [-z2, z1]  (half-rotated RoPE layout)
        parts = []
        for h in range(nh):
            z1 = z[:, h * Dh:h * Dh + Dh // 2]
            z2 = z[:, h * Dh + Dh // 2:(h + 1) * Dh]
            parts.append(-z2)
            parts.append(z1)
        return jnp.concatenate(parts, axis=-1)

    def kernel(xq_ref, xkv_ref, cq_ref, sq_ref, ck_ref, sk_ref, anw_ref,
               wq_ref, wk_ref, wv_ref, wo_ref, h_ref,
               q_scr, m_scr, l_scr, acc_scr):
        qi = pl.program_id(1)
        s = pl.program_id(2)
        kv_blk = qi - nback + s          # unclamped kv tile index (TKV == TQ)

        # ---- init: reset online-softmax state, build scaled + rope'd q -----
        @pl.when(s == 0)
        def _init():
            m_scr[...] = jnp.full_like(m_scr, NEG)
            l_scr[...] = jnp.zeros_like(l_scr)
            acc_scr[...] = jnp.zeros_like(acc_scr)
            yq = rmsnorm(xq_ref[0], anw_ref[...]).astype(cdt)
            qf = jnp.dot(yq, wq_ref[...], preferred_element_type=jnp.float32)
            # 1/sqrt(Dh) is folded into cq/sq in the wrapper.
            qf = qf * cq_ref[...] + rotate_half(qf, H) * sq_ref[...]
            for h in range(H):           # repack head-major: rows [h*TQ,(h+1)*TQ)
                q_scr[h * TQ:(h + 1) * TQ, :] = (
                    qf[:, h * Dh:(h + 1) * Dh].astype(cdt))

        # ---- one KV tile of the sliding window (skip tiles left of it) -----
        @pl.when(kv_blk >= 0)
        def _compute():
            ykv = rmsnorm(xkv_ref[0], anw_ref[...]).astype(cdt)
            kf = jnp.dot(ykv, wk_ref[...], preferred_element_type=jnp.float32)
            kf = (kf * ck_ref[...] + rotate_half(kf, J) * sk_ref[...]).astype(cdt)
            vf = jnp.dot(ykv, wv_ref[...],
                         preferred_element_type=jnp.float32).astype(cdt)

            # in-kernel causal + sliding-window mask from iota (no (T,T) input)
            q_pos = qi * TQ + lax.broadcasted_iota(jnp.int32, (TQ, 1), 0)
            q_pos = jnp.concatenate([q_pos] * G, axis=0)           # (G*TQ, 1)
            kv_pos = kv_blk * TQ + lax.broadcasted_iota(jnp.int32, (1, TQ), 1)
            in_win = (q_pos >= kv_pos) & (q_pos - kv_pos <= window)
            bias = jnp.where(in_win, 0.0, NEG)                     # (G*TQ, TQ)
            pmask = in_win.astype(jnp.float32)

            for j in range(J):           # static loop over kv heads
                r0, r1 = j * G * TQ, (j + 1) * G * TQ
                qg = q_scr[r0:r1, :]                               # (G*TQ, Dh)
                kj = kf[:, j * Dh:(j + 1) * Dh]                    # (TKV, Dh)
                vj = vf[:, j * Dh:(j + 1) * Dh]
                sg = lax.dot_general(qg, kj, (((1,), (1,)), ((), ())),
                                     preferred_element_type=jnp.float32)
                sg = sg + bias
                m_prev = m_scr[r0:r1, :]
                m_new = jnp.maximum(m_prev,
                                    jnp.max(sg, axis=-1, keepdims=True))
                alpha = jnp.exp(m_prev - m_new)
                p = jnp.exp(sg - m_new) * pmask
                l_scr[r0:r1, :] = (alpha * l_scr[r0:r1, :]
                                   + jnp.sum(p, axis=-1, keepdims=True))
                acc_scr[r0:r1, :] = (
                    alpha * acc_scr[r0:r1, :]
                    + jnp.dot(p.astype(cdt), vj,
                              preferred_element_type=jnp.float32))
                m_scr[r0:r1, :] = m_new

        # ---- finalize: normalize, out-project, add residual -----------------
        @pl.when(s == pl.num_programs(2) - 1)
        def _finalize():
            l = l_scr[...]
            inv = pl.reciprocal(l, approx=True)     # EUP reciprocal
            inv = inv * (2.0 - l * inv)             # one Newton step -> ~f32 exact
            accn = acc_scr[...] * inv               # (H*TQ, Dh)
            attn = jnp.concatenate(
                [accn[h * TQ:(h + 1) * TQ, :] for h in range(H)], axis=-1)
            out = jnp.dot(attn.astype(cdt), wo_ref[...],
                          preferred_element_type=jnp.float32)
            h_ref[0] = xq_ref[0] + out

    return kernel


# ---------------------------------------------------------------------------
# FFN kernel: RMSNorm -> SwiGLU (tiled over d_hid) -> residual
# ---------------------------------------------------------------------------
def _make_ffn_kernel(eps, cdt):
    def kernel(h_ref, fnw_ref, wg_ref, wu_ref, wd_ref, o_ref, y2_scr, acc_scr):
        kt = pl.program_id(2)

        @pl.when(kt == 0)
        def _init():
            hh = h_ref[0]
            ms = jnp.mean(hh * hh, axis=-1, keepdims=True)
            y2_scr[...] = (hh * lax.rsqrt(ms + eps) * fnw_ref[...]).astype(cdt)
            acc_scr[...] = jnp.zeros_like(acc_scr)

        y2 = y2_scr[...]
        gate = jnp.dot(y2, wg_ref[...], preferred_element_type=jnp.float32)
        up = jnp.dot(y2, wu_ref[...], preferred_element_type=jnp.float32)
        hid = (gate * jax.nn.sigmoid(gate) * up).astype(cdt)      # SiLU(g) * u
        acc_scr[...] += jnp.dot(hid, wd_ref[...],
                                preferred_element_type=jnp.float32)

        @pl.when(kt == pl.num_programs(2) - 1)
        def _final():
            o_ref[0] = h_ref[0] + acc_scr[...]

    return kernel


# ---------------------------------------------------------------------------
# wrapper
# ---------------------------------------------------------------------------
def mistral_block_pallas(x, freq_cis_tfc,
                         attn_norm_w, w_qkv_t, w_out_t,
                         ffn_norm_w, w_gate_t, w_up_t, w_down_t, *,
                         n_heads, n_kv_heads, window_size, norm_eps,
                         q_tile=8, hid_tile=128,
                         compute_dtype=jnp.bfloat16):
    B, T, E = x.shape
    H, J = n_heads, n_kv_heads
    Dh = E // H
    DKV = J * Dh
    d_hid = w_gate_t.shape[1]
    TQ, TH = q_tile, hid_tile
    assert H % J == 0 and Dh % 2 == 0
    assert T % TQ == 0 and d_hid % TH == 0

    NQ = T // TQ
    nback = (window_size + TQ - 1) // TQ      # kv tiles preceding the q tile
    NKV = nback + 1
    NH = d_hid // TH
    f32 = jnp.float32
    cdt = compute_dtype
    scale = 1.0 / math.sqrt(Dh)

    # RoPE tables in half-rotated layout; fold 1/sqrt(Dh) into the q tables.
    cos_tf = freq_cis_tfc[..., 0].astype(f32)             # (T, Dh//2)
    sin_tf = freq_cis_tfc[..., 1].astype(f32)
    cos_h = jnp.concatenate([cos_tf, cos_tf], axis=-1)    # (T, Dh)
    sin_h = jnp.concatenate([sin_tf, sin_tf], axis=-1)
    cos_q = jnp.tile(cos_h, (1, H)) * scale               # (T, E)
    sin_q = jnp.tile(sin_h, (1, H)) * scale
    cos_k = jnp.tile(cos_h, (1, J))                       # (T, DKV)
    sin_k = jnp.tile(sin_h, (1, J))

    # Split fused QKV weight; permute q/k columns into half-rotated order
    # (interleaved pair (2m, 2m+1) -> positions (m, Dh/2+m)) -- an exact
    # reparametrization, so in-kernel RoPE needs no permutation matmul.
    perm = np.concatenate([np.arange(0, Dh, 2), np.arange(1, Dh, 2)])
    idx_q = (np.arange(H)[:, None] * Dh + perm[None, :]).reshape(-1)
    idx_k = (np.arange(J)[:, None] * Dh + perm[None, :]).reshape(-1)
    wq = w_qkv_t[:, :E][:, idx_q].astype(cdt)
    wk = w_qkv_t[:, E:E + DKV][:, idx_k].astype(cdt)
    wv = w_qkv_t[:, E + DKV:].astype(cdt)
    wo = w_out_t.astype(cdt)
    wg = w_gate_t.astype(cdt)
    wu = w_up_t.astype(cdt)
    wd = w_down_t.astype(cdt)
    anw = jnp.asarray(attn_norm_w, f32).reshape(1, E)
    fnw = jnp.asarray(ffn_norm_w, f32).reshape(1, E)

    # TODO(synk): on v7x, mark constant-index weight BlockSpecs single-buffered
    # (pipeline_mode=pl.Buffered(1)) to halve their VMEM footprint.
    cparams = pltpu.CompilerParams(
        dimension_semantics=("parallel", "parallel", "arbitrary"),
        vmem_limit_bytes=48 * 1024 * 1024)

    kv_map3 = lambda b, qi, s: (b, jnp.maximum(qi - nback + s, 0), 0)
    kv_map2 = lambda b, qi, s: (jnp.maximum(qi - nback + s, 0), 0)

    attn_kernel = _make_attn_kernel(TQ, H, J, Dh, nback, window_size,
                                    norm_eps, cdt)
    h = pl.pallas_call(
        attn_kernel,
        out_shape=jax.ShapeDtypeStruct((B, T, E), x.dtype),
        grid=(B, NQ, NKV),
        in_specs=[
            pl.BlockSpec((1, TQ, E), lambda b, qi, s: (b, qi, 0)),   # x (q tile)
            pl.BlockSpec((1, TQ, E), kv_map3),                       # x (kv tile)
            pl.BlockSpec((TQ, E), lambda b, qi, s: (qi, 0)),         # cos_q*scale
            pl.BlockSpec((TQ, E), lambda b, qi, s: (qi, 0)),         # sin_q*scale
            pl.BlockSpec((TQ, DKV), kv_map2),                        # cos_k
            pl.BlockSpec((TQ, DKV), kv_map2),                        # sin_k
            pl.BlockSpec((1, E), lambda b, qi, s: (0, 0)),           # attn norm w
            pl.BlockSpec((E, E), lambda b, qi, s: (0, 0)),           # Wq
            pl.BlockSpec((E, DKV), lambda b, qi, s: (0, 0)),         # Wk
            pl.BlockSpec((E, DKV), lambda b, qi, s: (0, 0)),         # Wv
            pl.BlockSpec((E, E), lambda b, qi, s: (0, 0)),           # Wout
        ],
        out_specs=pl.BlockSpec((1, TQ, E), lambda b, qi, s: (b, qi, 0)),
        scratch_shapes=[
            pltpu.VMEM((H * TQ, Dh), cdt),      # rope'd, scaled q (head-major)
            pltpu.VMEM((H * TQ, 1), f32),       # running max
            pltpu.VMEM((H * TQ, 1), f32),       # running denominator
            pltpu.VMEM((H * TQ, Dh), f32),      # running numerator
        ],
        compiler_params=cparams,
    )(x, x, cos_q, sin_q, cos_k, sin_k, anw, wq, wk, wv, wo)

    ffn_kernel = _make_ffn_kernel(norm_eps, cdt)
    out = pl.pallas_call(
        ffn_kernel,
        out_shape=jax.ShapeDtypeStruct((B, T, E), x.dtype),
        grid=(B, NQ, NH),
        in_specs=[
            pl.BlockSpec((1, TQ, E), lambda b, i, k: (b, i, 0)),     # h
            pl.BlockSpec((1, E), lambda b, i, k: (0, 0)),            # ffn norm w
            pl.BlockSpec((E, TH), lambda b, i, k: (0, k)),           # W_gate slab
            pl.BlockSpec((E, TH), lambda b, i, k: (0, k)),           # W_up slab
            pl.BlockSpec((TH, E), lambda b, i, k: (k, 0)),           # W_down slab
        ],
        out_specs=pl.BlockSpec((1, TQ, E), lambda b, i, k: (b, i, 0)),
        scratch_shapes=[
            pltpu.VMEM((TQ, E), cdt),           # normalized h (reused per slab)
            pltpu.VMEM((TQ, E), f32),           # down-proj accumulator
        ],
        compiler_params=cparams,
    )(h, fnw, wg, wu, wd)

    return out


# ---------------------------------------------------------------------------
# pure-JAX reference (mirrors the PyTorch module, f32 end-to-end)
# ---------------------------------------------------------------------------
def _apply_rotary_ref(x_bhtd, cos_tf, sin_tf):
    B, Hh, T, D = x_bhtd.shape
    xr = x_bhtd.reshape(B, Hh, T, D // 2, 2)
    x0, x1 = xr[..., 0], xr[..., 1]
    c = cos_tf[None, None]
    s = sin_tf[None, None]
    o0 = x0 * c - x1 * s
    o1 = x1 * c + x0 * s
    return jnp.stack([o0, o1], axis=-1).reshape(B, Hh, T, D)


def mistral_block_ref(x, cos_tf, sin_tf, mask_bool, params, *, H, J, Dh, eps):
    def rms(z, w):
        ms = jnp.mean(z * z, axis=-1, keepdims=True)
        return z * lax.rsqrt(ms + eps) * w

    B, T, E = x.shape
    DKV = J * Dh
    y = rms(x, params["attn_norm_w"])
    qkv = y @ params["w_qkv_t"]
    q, k, v = qkv[..., :E], qkv[..., E:E + DKV], qkv[..., E + DKV:]

    def split_heads(z, nh):
        return z.reshape(B, T, nh, Dh).transpose(0, 2, 1, 3)

    qh = _apply_rotary_ref(split_heads(q, H), cos_tf, sin_tf)
    kh = _apply_rotary_ref(split_heads(k, J), cos_tf, sin_tf)
    vh = split_heads(v, J)
    G = H // J
    kh = jnp.repeat(kh, G, axis=1)     # repeat_interleave over head axis
    vh = jnp.repeat(vh, G, axis=1)

    s = jnp.einsum('bhtd,bhsd->bhts', qh, kh) / math.sqrt(Dh)
    s = jnp.where(mask_bool[None, None], s, -jnp.inf)
    p = jax.nn.softmax(s, axis=-1)
    o = jnp.einsum('bhts,bhsd->bhtd', p, vh)
    o = o.transpose(0, 2, 1, 3).reshape(B, T, E)
    h = x + o @ params["w_out_t"]

    y2 = rms(h, params["ffn_norm_w"])
    gate = y2 @ params["w_gate_t"]
    up = y2 @ params["w_up_t"]
    down = (gate * jax.nn.sigmoid(gate) * up) @ params["w_down_t"]
    return h + down


if __name__ == "__main__":
    # small but representative shapes (multi-tile in T and d_hid)
    B, T = 2, 32
    d_embd, n_heads, n_kv_heads = 64, 4, 2
    d_hid = 256
    window_size = 10
    norm_eps = 1e-5
    Dh = d_embd // n_heads
    d_kv = n_kv_heads * Dh

    key = jax.random.PRNGKey(0)
    ks = jax.random.split(key, 8)
    x = jax.random.normal(ks[0], (B, T, d_embd), jnp.float32)
    w_qkv = jax.random.normal(ks[1], (d_embd + 2 * d_kv, d_embd), jnp.float32) * 0.1
    w_out = jax.random.normal(ks[2], (d_embd, d_embd), jnp.float32) * 0.1
    w_gate = jax.random.normal(ks[3], (d_hid, d_embd), jnp.float32) * 0.1
    w_up = jax.random.normal(ks[4], (d_hid, d_embd), jnp.float32) * 0.1
    w_down = jax.random.normal(ks[5], (d_embd, d_hid), jnp.float32) * 0.1
    attn_norm_w = 1.0 + 0.1 * jax.random.normal(ks[6], (d_embd,), jnp.float32)
    ffn_norm_w = 1.0 + 0.1 * jax.random.normal(ks[7], (d_embd,), jnp.float32)

    # rotary table matching the torch freq_cis_TFC = (T, Dh/2, 2) layout
    theta = 10000.0
    inv_freq = 1.0 / theta ** (jnp.arange(0, Dh, 2, dtype=jnp.float32) / Dh)
    ang = jnp.arange(T, dtype=jnp.float32)[:, None] * inv_freq[None, :]
    cos_tf, sin_tf = jnp.cos(ang), jnp.sin(ang)              # (T, Dh/2)
    freq_cis_tfc = jnp.stack([cos_tf, sin_tf], axis=-1)      # (T, Dh/2, 2)

    args = (x, freq_cis_tfc, attn_norm_w, w_qkv.T, w_out.T,
            ffn_norm_w, w_gate.T, w_up.T, w_down.T)
    kw = dict(n_heads=n_heads, n_kv_heads=n_kv_heads,
              window_size=window_size, norm_eps=norm_eps,
              q_tile=8, hid_tile=128)

    # reference: sliding-window causal mask (same predicate the torch
    # flex-attention block mask / sdpa attn_mask encodes)
    qi = jnp.arange(T)[:, None]
    ki = jnp.arange(T)[None, :]
    mask_bool = (qi >= ki) & (qi - ki <= window_size)
    ref_params = dict(attn_norm_w=attn_norm_w, w_qkv_t=w_qkv.T, w_out_t=w_out.T,
                      ffn_norm_w=ffn_norm_w, w_gate_t=w_gate.T, w_up_t=w_up.T,
                      w_down_t=w_down.T)
    ref = mistral_block_ref(x, cos_tf, sin_tf, mask_bool, ref_params,
                            H=n_heads, J=n_kv_heads, Dh=Dh, eps=norm_eps)

    # exact-precision path (f32 matmuls) -- tight check
    out_f32 = jax.block_until_ready(
        mistral_block_pallas(*args, compute_dtype=jnp.float32, **kw))
    np.testing.assert_allclose(np.asarray(out_f32), np.asarray(ref),
                               rtol=3e-3, atol=3e-3)

    # production path (bf16 MXU inputs, f32 accumulation) -- loose check
    out_bf16 = jax.block_until_ready(
        mistral_block_pallas(*args, compute_dtype=jnp.bfloat16, **kw))
    np.testing.assert_allclose(np.asarray(out_bf16), np.asarray(ref),
                               rtol=6e-2, atol=6e-2)

    print("KERNEL_OK")
</pallas_src>

<mosaic_0001>
module attributes {stable_mosaic.version = 11 : i64} {
  func.func @kernel(%arg0: i32, %arg1: i32, %arg2: i32, %arg3: memref<1x8x64xf32, #tpu.memory_space<vmem>>, %arg4: memref<1x8x64xf32, #tpu.memory_space<vmem>>, %arg5: memref<8x64xf32, #tpu.memory_space<vmem>>, %arg6: memref<8x64xf32, #tpu.memory_space<vmem>>, %arg7: memref<8x32xf32, #tpu.memory_space<vmem>>, %arg8: memref<8x32xf32, #tpu.memory_space<vmem>>, %arg9: memref<1x64xf32, #tpu.memory_space<vmem>>, %arg10: memref<64x64xf32, #tpu.memory_space<vmem>>, %arg11: memref<64x32xf32, #tpu.memory_space<vmem>>, %arg12: memref<64x32xf32, #tpu.memory_space<vmem>>, %arg13: memref<64x64xf32, #tpu.memory_space<vmem>>, %arg14: memref<1x8x64xf32, #tpu.memory_space<vmem>>, %arg15: memref<32x16xf32, #tpu.memory_space<vmem>>, %arg16: memref<32x1xf32, #tpu.memory_space<vmem>>, %arg17: memref<32x1xf32, #tpu.memory_space<vmem>>, %arg18: memref<32x16xf32, #tpu.memory_space<vmem>>) attributes {dimension_semantics = [#tpu.dimension_semantics<parallel>, #tpu.dimension_semantics<parallel>, #tpu.dimension_semantics<arbitrary>], iteration_bounds = array<i64: 2, 4, 3>, scalar_prefetch = 0 : i64, scratch_operands = 4 : i64, tpu.core_type = #tpu.core_type<tc>, window_params = [{transform_indices = @transform_0, window_bounds = array<i64: 1, 8, 64>}, {transform_indices = @transform_1, window_bounds = array<i64: 1, 8, 64>}, {transform_indices = @transform_2, window_bounds = array<i64: 8, 64>}, {transform_indices = @transform_3, window_bounds = array<i64: 8, 64>}, {transform_indices = @transform_4, window_bounds = array<i64: 8, 32>}, {transform_indices = @transform_5, window_bounds = array<i64: 8, 32>}, {pipeline_mode = #tpu.pipeline_mode<synchronous>, transform_indices = @transform_6, window_bounds = array<i64: 1, 64>}, {pipeline_mode = #tpu.pipeline_mode<synchronous>, transform_indices = @transform_7, window_bounds = array<i64: 64, 64>}, {pipeline_mode = #tpu.pipeline_mode<synchronous>, transform_indices = @transform_8, window_bounds = array<i64: 64, 32>}, {pipeline_mode = #tpu.pipeline_mode<synchronous>, transform_indices = @transform_9, window_bounds = array<i64: 64, 32>}, {pipeline_mode = #tpu.pipeline_mode<synchronous>, transform_indices = @transform_10, window_bounds = array<i64: 64, 64>}, {transform_indices = @transform_11, window_bounds = array<i64: 1, 8, 64>}]} {
    %c2_i32 = arith.constant 2 : i32
    %0 = arith.subi %arg1, %c2_i32 : i32
    %1 = arith.addi %0, %arg2 : i32
    %c0_i32 = arith.constant 0 : i32
    %2 = arith.cmpi eq, %arg2, %c0_i32 : i32
    %3 = arith.extui %2 : i1 to i32
    %c0_i32_0 = arith.constant 0 : i32
    %4 = arith.cmpi ne, %3, %c0_i32_0 : i32
    scf.if %4 {
      %cst = arith.constant -1.000000e+30 : f32
      %11 = vector.broadcast %cst : f32 to vector<32x1xf32>
      %c0 = arith.constant 0 : index
      %c0_5 = arith.constant 0 : index
      %12 = vector.load %arg16[%c0, %c0_5] : memref<32x1xf32, #tpu.memory_space<vmem>>, vector<32x1xf32>
      tpu.vector_store %arg16[%c0, %c0_5], %11 {strides = array<i32>} : memref<32x1xf32, #tpu.memory_space<vmem>>, vector<32x1xf32>,
      %cst_6 = arith.constant 0.000000e+00 : f32
      %13 = vector.broadcast %cst_6 : f32 to vector<32x1xf32>
      %c0_7 = arith.constant 0 : index
      %c0_8 = arith.constant 0 : index
      %14 = vector.load %arg17[%c0_7, %c0_8] : memref<32x1xf32, #tpu.memory_space<vmem>>, vector<32x1xf32>
      tpu.vector_store %arg17[%c0_7, %c0_8], %13 {strides = array<i32>} : memref<32x1xf32, #tpu.memory_space<vmem>>, vector<32x1xf32>,
      %cst_9 = arith.constant 0.000000e+00 : f32
      %15 = vector.broadcast %cst_9 : f32 to vector<32x16xf32>
      %c0_10 = arith.constant 0 : index
      %c0_11 = arith.constant 0 : index
      %16 = vector.load %arg18[%c0_10, %c0_11] : memref<32x16xf32, #tpu.memory_space<vmem>>, vector<32x16xf32>
      tpu.vector_store %arg18[%c0_10, %c0_11], %15 {strides = array<i32>} : memref<32x16xf32, #tpu.memory_space<vmem>>, vector<32x16xf32>,
      %c0_12 = arith.constant 0 : index
      %c0_13 = arith.constant 0 : index
      %c0_14 = arith.constant 0 : index
      %17 = vector.load %arg3[%c0_12, %c0_13, %c0_14] : memref<1x8x64xf32, #tpu.memory_space<vmem>>, vector<1x8x64xf32>
      %18 = vector.shape_cast %17 : vector<1x8x64xf32> to vector<8x64xf32>
      %c0_15 = arith.constant 0 : index
      %c0_16 = arith.constant 0 : index
      %19 = vector.load %arg9[%c0_15, %c0_16] : memref<1x64xf32, #tpu.memory_space<vmem>>, vector<1x64xf32>
      %20 = arith.mulf %18, %18 : vector<8x64xf32>
      %cst_17 = arith.constant dense<0.000000e+00> : vector<8xf32>
      %21 = vector.multi_reduction <add>, %20, %cst_17 [1] : vector<8x64xf32> to vector<8xf32>
      %22 = vector.shape_cast %21 : vector<8xf32> to vector<8x1xf32>
      %cst_18 = arith.constant 6.400000e+01 : f32
      %23 = vector.broadcast %cst_18 : f32 to vector<8x1xf32>
      %24 = arith.divf %22, %23 : vector<8x1xf32>
      %cst_19 = arith.constant 9.99999974E-6 : f32
      %25 = vector.broadcast %cst_19 : f32 to vector<8x1xf32>
      %26 = arith.addf %24, %25 : vector<8x1xf32>
      %27 = math.rsqrt %26 : vector<8x1xf32>
      %28 = vector.broadcast %27 : vector<8x1xf32> to vector<8x64xf32>
      %29 = arith.mulf %18, %28 : vector<8x64xf32>
      %30 = vector.broadcast %19 : vector<1x64xf32> to vector<8x64xf32>
      %31 = arith.mulf %29, %30 : vector<8x64xf32>
      %c0_20 = arith.constant 0 : index
      %c0_21 = arith.constant 0 : index
      %32 = vector.load %arg10[%c0_20, %c0_21] : memref<64x64xf32, #tpu.memory_space<vmem>>, vector<64x64xf32>
      %cst_22 = arith.constant dense<0.000000e+00> : vector<8x64xf32>
      %33 = tpu.matmul %31, %32, %cst_22 {dimension_numbers = #tpu.dot_dimension_numbers<[1], [0], [0], [1], [0, 0, 1, 1], [], []>} : vector<8x64xf32>, vector<64x64xf32>, vector<8x64xf32> -> vector<8x64xf32>
      %c0_23 = arith.constant 0 : index
      %c0_24 = arith.constant 0 : index
      %34 = vector.load %arg5[%c0_23, %c0_24] : memref<8x64xf32, #tpu.memory_space<vmem>>, vector<8x64xf32>
      %35 = arith.mulf %33, %34 : vector<8x64xf32>
      %36 = vector.extract_strided_slice %33 {offsets = [0, 0], sizes = [8, 8], strides = [1, 1]} : vector<8x64xf32> to vector<8x8xf32>
      %37 = vector.extract_strided_slice %33 {offsets = [0, 8], sizes = [8, 8], strides = [1, 1]} : vector<8x64xf32> to vector<8x8xf32>
      %cst_25 = arith.constant 0.000000e+00 : f32
      %38 = vector.broadcast %cst_25 : f32 to vector<8x8xf32>
      %39 = arith.subf %38, %37 : vector<8x8xf32>
      %40 = vector.extract_strided_slice %33 {offsets = [0, 16], sizes = [8, 8], strides = [1, 1]} : vector<8x64xf32> to vector<8x8xf32>
      %41 = vector.extract_strided_slice %33 {offsets = [0, 24], sizes = [8, 8], strides = [1, 1]} : vector<8x64xf32> to vector<8x8xf32>
      %cst_26 = arith.constant 0.000000e+00 : f32
      %42 = vector.broadcast %cst_26 : f32 to vector<8x8xf32>
      %43 = arith.subf %42, %41 : vector<8x8xf32>
      %44 = vector.extract_strided_slice %33 {offsets = [0, 32], sizes = [8, 8], strides = [1, 1]} : vector<8x64xf32> to vector<8x8xf32>
      %45 = vector.extract_strided_slice %33 {offsets = [0, 40], sizes = [8, 8], strides = [1, 1]} : vector<8x64xf32> to vector<8x8xf32>
      %cst_27 = arith.constant 0.000000e+00 : f32
      %46 = vector.broadcast %cst_27 : f32 to vector<8x8xf32>
      %47 = arith.subf %46, %45 : vector<8x8xf32>
      %48 = vector.extract_strided_slice %33 {offsets = [0, 48], sizes = [8, 8], strides = [1, 1]} : vector<8x64xf32> to vector<8x8xf32>
      %49 = vector.extract_strided_slice %33 {offsets = [0, 56], sizes = [8, 8], strides = [1, 1]} : vector<8x64xf32> to vector<8x8xf32>
      %cst_28 = arith.constant 0.000000e+00 : f32
      %50 = vector.broadcast %cst_28 : f32 to vector<8x8xf32>
      %51 = arith.subf %50, %49 : vector<8x8xf32>
      %52 = tpu.concatenate %39, %36, %43, %40, %47, %44, %51, %48 in 1 : vector<8x8xf32>, vector<8x8xf32>, vector<8x8xf32>, vector<8x8xf32>, vector<8x8xf32>, vector<8x8xf32>, vector<8x8xf32>, vector<8x8xf32> -> vector<8x64xf32>
      %c0_29 = arith.constant 0 : index
      %c0_30 = arith.constant 0 : index
      %53 = vector.load %arg6[%c0_29, %c0_30] : memref<8x64xf32, #tpu.memory_space<vmem>>, vector<8x64xf32>
      %54 = arith.mulf %52, %53 : vector<8x64xf32>
      %55 = arith.addf %35, %54 : vector<8x64xf32>
      %56 = vector.extract_strided_slice %55 {offsets = [0, 0], sizes = [8, 16], strides = [1, 1]} : vector<8x64xf32> to vector<8x16xf32>
      %c0_31 = arith.constant 0 : index
      %c0_32 = arith.constant 0 : index
      %57 = vector.load %arg15[%c0_31, %c0_32] : memref<32x16xf32, #tpu.memory_space<vmem>>, vector<8x16xf32>
      tpu.vector_store %arg15[%c0_31, %c0_32], %56 {strides = array<i32>} : memref<32x16xf32, #tpu.memory_space<vmem>>, vector<8x16xf32>,
      %58 = vector.extract_strided_slice %55 {offsets = [0, 16], sizes = [8, 16], strides = [1, 1]} : vector<8x64xf32> to vector<8x16xf32>
      %c8 = arith.constant 8 : index
      %c0_33 = arith.constant 0 : index
      %59 = vector.load %arg15[%c8, %c0_33] : memref<32x16xf32, #tpu.memory_space<vmem>>, vector<8x16xf32>
      tpu.vector_store %arg15[%c8, %c0_33], %58 {strides = array<i32>} : memref<32x16xf32, #tpu.memory_space<vmem>>, vector<8x16xf32>,
      %60 = vector.extract_strided_slice %55 {offsets = [0, 32], sizes = [8, 16], strides = [1, 1]} : vector<8x64xf32> to vector<8x16xf32>
      %c16 = arith.constant 16 : index
      %c0_34 = arith.constant 0 : index
      %61 = vector.load %arg15[%c16, %c0_34] : memref<32x16xf32, #tpu.memory_space<vmem>>, vector<8x16xf32>
      tpu.vector_store %arg15[%c16, %c0_34], %60 {strides = array<i32>} : memref<32x16xf32, #tpu.memory_space<vmem>>, vector<8x16xf32>,
      %62 = vector.extract_strided_slice %55 {offsets = [0, 48], sizes = [8, 16], strides = [1, 1]} : vector<8x64xf32> to vector<8x16xf32>
      %c24 = arith.constant 24 : index
      %c0_35 = arith.constant 0 : index
      %63 = vector.load %arg15[%c24, %c0_35] : memref<32x16xf32, #tpu.memory_space<vmem>>, vector<8x16xf32>
      tpu.vector_store %arg15[%c24, %c0_35], %62 {strides = array<i32>} : memref<32x16xf32, #tpu.memory_space<vmem>>, vector<8x16xf32>,
    } else {
    }
    %c0_i32_1 = arith.constant 0 : i32
    %5 = arith.cmpi sge, %1, %c0_i32_1 : i32
    %6 = arith.extui %5 : i1 to i32
    %c0_i32_2 = arith.constant 0 : i32
    %7 = arith.cmpi ne, %6, %c0_i32_2 : i32
    scf.if %7 {
      %c0 = arith.constant 0 : index
      %c0_5 = arith.constant 0 : index
      %c0_6 = arith.constant 0 : index
      %11 = vector.load %arg4[%c0, %c0_5, %c0_6] : memref<1x8x64xf32, #tpu.memory_space<vmem>>, vector<1x8x64xf32>
      %12 = vector.shape_cast %11 : vector<1x8x64xf32> to vector<8x64xf32>
      %c0_7 = arith.constant 0 : index
      %c0_8 = arith.constant 0 : index
      %13 = vector.load %arg9[%c0_7, %c0_8] : memref<1x64xf32, #tpu.memory_space<vmem>>, vector<1x64xf32>
      %14 = arith.mulf %12, %12 : vector<8x64xf32>
      %cst = arith.constant dense<0.000000e+00> : vector<8xf32>
      %15 = vector.multi_reduction <add>, %14, %cst [1] : vector<8x64xf32> to vector<8xf32>
      %16 = vector.shape_cast %15 : vector<8xf32> to vector<8x1xf32>
      %cst_9 = arith.constant 6.400000e+01 : f32
      %17 = vector.broadcast %cst_9 : f32 to vector<8x1xf32>
      %18 = arith.divf %16, %17 : vector<8x1xf32>
      %cst_10 = arith.constant 9.99999974E-6 : f32
      %19 = vector.broadcast %cst_10 : f32 to vector<8x1xf32>
      %20 = arith.addf %18, %19 : vector<8x1xf32>
      %21 = math.rsqrt %20 : vector<8x1xf32>
      %22 = vector.broadcast %21 : vector<8x1xf32> to vector<8x64xf32>
      %23 = arith.mulf %12, %22 : vector<8x64xf32>
      %24 = vector.broadcast %13 : vector<1x64xf32> to vector<8x64xf32>
      %25 = arith.mulf %23, %24 : vector<8x64xf32>
      %c0_11 = arith.constant 0 : index
      %c0_12 = arith.constant 0 : index
      %26 = vector.load %arg11[%c0_11, %c0_12] : memref<64x32xf32, #tpu.memory_space<vmem>>, vector<64x32xf32>
      %cst_13 = arith.constant dense<0.000000e+00> : vector<8x32xf32>
      %27 = tpu.matmul %25, %26, %cst_13 {dimension_numbers = #tpu.dot_dimension_numbers<[1], [0], [0], [1], [0, 0, 1, 1], [], []>} : vector<8x64xf32>, vector<64x32xf32>, vector<8x32xf32> -> vector<8x32xf32>
      %c0_14 = arith.constant 0 : index
      %c0_15 = arith.constant 0 : index
      %28 = vector.load %arg7[%c0_14, %c0_15] : memref<8x32xf32, #tpu.memory_space<vmem>>, vector<8x32xf32>
      %29 = arith.mulf %27, %28 : vector<8x32xf32>
      %30 = vector.extract_strided_slice %27 {offsets = [0, 0], sizes = [8, 8], strides = [1, 1]} : vector<8x32xf32> to vector<8x8xf32>
      %31 = vector.extract_strided_slice %27 {offsets = [0, 8], sizes = [8, 8], strides = [1, 1]} : vector<8x32xf32> to vector<8x8xf32>
      %cst_16 = arith.constant 0.000000e+00 : f32
      %32 = vector.broadcast %cst_16 : f32 to vector<8x8xf32>
      %33 = arith.subf %32, %31 : vector<8x8xf32>
      %34 = vector.extract_strided_slice %27 {offsets = [0, 16], sizes = [8, 8], strides = [1, 1]} : vector<8x32xf32> to vector<8x8xf32>
      %35 = vector.extract_strided_slice %27 {offsets = [0, 24], sizes = [8, 8], strides = [1, 1]} : vector<8x32xf32> to vector<8x8xf32>
      %cst_17 = arith.constant 0.000000e+00 : f32
      %36 = vector.broadcast %cst_17 : f32 to vector<8x8xf32>
      %37 = arith.subf %36, %35 : vector<8x8xf32>
      %38 = tpu.concatenate %33, %30, %37, %34 in 1 : vector<8x8xf32>, vector<8x8xf32>, vector<8x8xf32>, vector<8x8xf32> -> vector<8x32xf32>
      %c0_18 = arith.constant 0 : index
      %c0_19 = arith.constant 0 : index
      %39 = vector.load %arg8[%c0_18, %c0_19] : memref<8x32xf32, #tpu.memory_space<vmem>>, vector<8x32xf32>
      %40 = arith.mulf %38, %39 : vector<8x32xf32>
      %41 = arith.addf %29, %40 : vector<8x32xf32>
      %c0_20 = arith.constant 0 : index
      %c0_21 = arith.constant 0 : index
      %42 = vector.load %arg12[%c0_20, %c0_21] : memref<64x32xf32, #tpu.memory_space<vmem>>, vector<64x32xf32>
      %cst_22 = arith.constant dense<0.000000e+00> : vector<8x32xf32>
      %43 = tpu.matmul %25, %42, %cst_22 {dimension_numbers = #tpu.dot_dimension_numbers<[1], [0], [0], [1], [0, 0, 1, 1], [], []>} : vector<8x64xf32>, vector<64x32xf32>, vector<8x32xf32> -> vector<8x32xf32>
      %c8_i32 = arith.constant 8 : i32
      %44 = arith.muli %arg1, %c8_i32 : i32
      %45 = tpu.iota {dimensions = array<i32: 0>} : vector<8x1xi32>
      %46 = vector.broadcast %44 : i32 to vector<8x1xi32>
      %47 = arith.addi %46, %45 : vector<8x1xi32>
      %48 = tpu.concatenate %47, %47 in 0 : vector<8x1xi32>, vector<8x1xi32> -> vector<16x1xi32>
      %c8_i32_23 = arith.constant 8 : i32
      %49 = arith.muli %1, %c8_i32_23 : i32
      %50 = tpu.iota {dimensions = array<i32: 1>} : vector<1x8xi32>
      %51 = vector.broadcast %49 : i32 to vector<1x8xi32>
      %52 = arith.addi %51, %50 : vector<1x8xi32>
      %53 = vector.broadcast %48 : vector<16x1xi32> to vector<16x8xi32>
      %54 = vector.broadcast %52 : vector<1x8xi32> to vector<16x8xi32>
      %55 = arith.cmpi sge, %53, %54 : vector<16x8xi32>
      %56 = vector.broadcast %48 : vector<16x1xi32> to vector<16x8xi32>
      %57 = vector.broadcast %52 : vector<1x8xi32> to vector<16x8xi32>
      %58 = arith.subi %56, %57 : vector<16x8xi32>
      %c10_i32 = arith.constant 10 : i32
      %59 = vector.broadcast %c10_i32 : i32 to vector<16x8xi32>
      %60 = arith.cmpi sle, %58, %59 : vector<16x8xi32>
      %61 = arith.andi %55, %60 : vector<16x8xi1>
      %cst_24 = arith.constant 0.000000e+00 : f32
      %cst_25 = arith.constant -1.000000e+30 : f32
      %62 = vector.broadcast %cst_24 : f32 to vector<16x8xf32>
      %63 = vector.broadcast %cst_25 : f32 to vector<16x8xf32>
      %64 = arith.select %61, %62, %63 : vector<16x8xi1>, vector<16x8xf32>
      %65 = arith.extui %61 : vector<16x8xi1> to vector<16x8xi32>
      %66 = arith.sitofp %65 : vector<16x8xi32> to vector<16x8xf32>
      %c0_26 = arith.constant 0 : index
      %c0_27 = arith.constant 0 : index
      %67 = vector.load %arg15[%c0_26, %c0_27] : memref<32x16xf32, #tpu.memory_space<vmem>>, vector<16x16xf32>
      %68 = vector.extract_strided_slice %41 {offsets = [0, 0], sizes = [8, 16], strides = [1, 1]} : vector<8x32xf32> to vector<8x16xf32>
      %69 = vector.extract_strided_slice %43 {offsets = [0, 0], sizes = [8, 16], strides = [1, 1]} : vector<8x32xf32> to vector<8x16xf32>
      %cst_28 = arith.constant dense<0.000000e+00> : vector<16x8xf32>
      %70 = tpu.matmul %67, %68, %cst_28 {dimension_numbers = #tpu.dot_dimension_numbers<[1], [1], [0], [0], [0, 0, 1, 0], [], []>} : vector<16x16xf32>, vector<8x16xf32>, vector<16x8xf32> -> vector<16x8xf32>
      %71 = arith.addf %70, %64 : vector<16x8xf32>
      %c0_29 = arith.constant 0 : index
      %c0_30 = arith.constant 0 : index
      %72 = vector.load %arg16[%c0_29, %c0_30] : memref<32x1xf32, #tpu.memory_space<vmem>>, vector<16x1xf32>
      %cst_31 = arith.constant dense<0xFF800000> : vector<16xf32>
      %73 = vector.multi_reduction <maximumf>, %71, %cst_31 [1] : vector<16x8xf32> to vector<16xf32>
      %74 = vector.shape_cast %73 : vector<16xf32> to vector<16x1xf32>
      %75 = arith.maximumf %72, %74 : vector<16x1xf32>
      %76 = arith.subf %72, %75 : vector<16x1xf32>
      %77 = math.exp %76 : vector<16x1xf32>
      %78 = vector.broadcast %75 : vector<16x1xf32> to vector<16x8xf32>
      %79 = arith.subf %71, %78 : vector<16x8xf32>
      %80 = math.exp %79 : vector<16x8xf32>
      %81 = arith.mulf %80, %66 : vector<16x8xf32>
      %c0_32 = arith.constant 0 : index
      %c0_33 = arith.constant 0 : index
      %82 = vector.load %arg17[%c0_32, %c0_33] : memref<32x1xf32, #tpu.memory_space<vmem>>, vector<16x1xf32>
      %83 = arith.mulf %77, %82 : vector<16x1xf32>
      %cst_34 = arith.constant dense<0.000000e+00> : vector<16xf32>
      %84 = vector.multi_reduction <add>, %81, %cst_34 [1] : vector<16x8xf32> to vector<16xf32>
      %85 = vector.shape_cast %84 : vector<16xf32> to vector<16x1xf32>
      %86 = arith.addf %83, %85 : vector<16x1xf32>
      %c0_35 = arith.constant 0 : index
      %c0_36 = arith.constant 0 : index
      %87 = vector.load %arg17[%c0_35, %c0_36] : memref<32x1xf32, #tpu.memory_space<vmem>>, vector<16x1xf32>
      tpu.vector_store %arg17[%c0_35, %c0_36], %86 {strides = array<i32>} : memref<32x1xf32, #tpu.memory_space<vmem>>, vector<16x1xf32>,
      %c0_37 = arith.constant 0 : index
      %c0_38 = arith.constant 0 : index
      %88 = vector.load %arg18[%c0_37, %c0_38] : memref<32x16xf32, #tpu.memory_space<vmem>>, vector<16x16xf32>
      %89 = vector.broadcast %77 : vector<16x1xf32> to vector<16x16xf32>
      %90 = arith.mulf %89, %88 : vector<16x16xf32>
      %cst_39 = arith.constant dense<0.000000e+00> : vector<16x16xf32>
      %91 = tpu.matmul %81, %69, %cst_39 {dimension_numbers = #tpu.dot_dimension_numbers<[1], [0], [0], [1], [0, 0, 1, 1], [], []>} : vector<16x8xf32>, vector<8x16xf32>, vector<16x16xf32> -> vector<16x16xf32>
      %92 = arith.addf %90, %91 : vector<16x16xf32>
      %c0_40 = arith.constant 0 : index
      %c0_41 = arith.constant 0 : index
      %93 = vector.load %arg18[%c0_40, %c0_41] : memref<32x16xf32, #tpu.memory_space<vmem>>, vector<16x16xf32>
      tpu.vector_store %arg18[%c0_40, %c0_41], %92 {strides = array<i32>} : memref<32x16xf32, #tpu.memory_space<vmem>>, vector<16x16xf32>,
      %c0_42 = arith.constant 0 : index
      %c0_43 = arith.constant 0 : index
      %94 = vector.load %arg16[%c0_42, %c0_43] : memref<32x1xf32, #tpu.memory_space<vmem>>, vector<16x1xf32>
      tpu.vector_store %arg16[%c0_42, %c0_43], %75 {strides = array<i32>} : memref<32x1xf32, #tpu.memory_space<vmem>>, vector<16x1xf32>,
      %c16 = arith.constant 16 : index
      %c0_44 = arith.constant 0 : index
      %95 = vector.load %arg15[%c16, %c0_44] : memref<32x16xf32, #tpu.memory_space<vmem>>, vector<16x16xf32>
      %96 = vector.extract_strided_slice %41 {offsets = [0, 16], sizes = [8, 16], strides = [1, 1]} : vector<8x32xf32> to vector<8x16xf32>
      %97 = vector.extract_strided_slice %43 {offsets = [0, 16], sizes = [8, 16], strides = [1, 1]} : vector<8x32xf32> to vector<8x16xf32>
      %cst_45 = arith.constant dense<0.000000e+00> : vector<16x8xf32>
      %98 = tpu.matmul %95, %96, %cst_45 {dimension_numbers = #tpu.dot_dimension_numbers<[1], [1], [0], [0], [0, 0, 1, 0], [], []>} : vector<16x16xf32>, vector<8x16xf32>, vector<16x8xf32> -> vector<16x8xf32>
      %99 = arith.addf %98, %64 : vector<16x8xf32>
      %c16_46 = arith.constant 16 : index
      %c0_47 = arith.constant 0 : index
      %100 = vector.load %arg16[%c16_46, %c0_47] : memref<32x1xf32, #tpu.memory_space<vmem>>, vector<16x1xf32>
      %cst_48 = arith.constant dense<0xFF800000> : vector<16xf32>
      %101 = vector.multi_reduction <maximumf>, %99, %cst_48 [1] : vector<16x8xf32> to vector<16xf32>
      %102 = vector.shape_cast %101 : vector<16xf32> to vector<16x1xf32>
      %103 = arith.maximumf %100, %102 : vector<16x1xf32>
      %104 = arith.subf %100, %103 : vector<16x1xf32>
      %105 = math.exp %104 : vector<16x1xf32>
      %106 = vector.broadcast %103 : vector<16x1xf32> to vector<16x8xf32>
      %107 = arith.subf %99, %106 : vector<16x8xf32>
      %108 = math.exp %107 : vector<16x8xf32>
      %109 = arith.mulf %108, %66 : vector<16x8xf32>
      %c16_49 = arith.constant 16 : index
      %c0_50 = arith.constant 0 : index
      %110 = vector.load %arg17[%c16_49, %c0_50] : memref<32x1xf32, #tpu.memory_space<vmem>>, vector<16x1xf32>
      %111 = arith.mulf %105, %110 : vector<16x1xf32>
      %cst_51 = arith.constant dense<0.000000e+00> : vector<16xf32>
      %112 = vector.multi_reduction <add>, %109, %cst_51 [1] : vector<16x8xf32> to vector<16xf32>
      %113 = vector.shape_cast %112 : vector<16xf32> to vector<16x1xf32>
      %114 = arith.addf %111, %113 : vector<16x1xf32>
      %c16_52 = arith.constant 16 : index
      %c0_53 = arith.constant 0 : index
      %115 = vector.load %arg17[%c16_52, %c0_53] : memref<32x1xf32, #tpu.memory_space<vmem>>, vector<16x1xf32>
      tpu.vector_store %arg17[%c16_52, %c0_53], %114 {strides = array<i32>} : memref<32x1xf32, #tpu.memory_space<vmem>>, vector<16x1xf32>,
      %c16_54 = arith.constant 16 : index
      %c0_55 = arith.constant 0 : index
      %116 = vector.load %arg18[%c16_54, %c0_55] : memref<32x16xf32, #tpu.memory_space<vmem>>, vector<16x16xf32>
      %117 = vector.broadcast %105 : vector<16x1xf32> to vector<16x16xf32>
      %118 = arith.mulf %117, %116 : vector<16x16xf32>
      %cst_56 = arith.constant dense<0.000000e+00> : vector<16x16xf32>
      %119 = tpu.matmul %109, %97, %cst_56 {dimension_numbers = #tpu.dot_dimension_numbers<[1], [0], [0], [1], [0, 0, 1, 1], [], []>} : vector<16x8xf32>, vector<8x16xf32>, vector<16x16xf32> -> vector<16x16xf32>
      %120 = arith.addf %118, %119 : vector<16x16xf32>
      %c16_57 = arith.constant 16 : index
      %c0_58 = arith.constant 0 : index
      %121 = vector.load %arg18[%c16_57, %c0_58] : memref<32x16xf32, #tpu.memory_space<vmem>>, vector<16x16xf32>
      tpu.vector_store %arg18[%c16_57, %c0_58], %120 {strides = array<i32>} : memref<32x16xf32, #tpu.memory_space<vmem>>, vector<16x16xf32>,
      %c16_59 = arith.constant 16 : index
      %c0_60 = arith.constant 0 : index
      %122 = vector.load %arg16[%c16_59, %c0_60] : memref<32x1xf32, #tpu.memory_space<vmem>>, vector<16x1xf32>
      tpu.vector_store %arg16[%c16_59, %c0_60], %103 {strides = array<i32>} : memref<32x1xf32, #tpu.memory_space<vmem>>, vector<16x1xf32>,
    } else {
    }
    %c2_i32_3 = arith.constant 2 : i32
    %8 = arith.cmpi eq, %arg2, %c2_i32_3 : i32
    %9 = arith.extui %8 : i1 to i32
    %c0_i32_4 = arith.constant 0 : i32
    %10 = arith.cmpi ne, %9, %c0_i32_4 : i32
    scf.if %10 {
      %c0 = arith.constant 0 : index
      %c0_5 = arith.constant 0 : index
      %11 = vector.load %arg17[%c0, %c0_5] : memref<32x1xf32, #tpu.memory_space<vmem>>, vector<32x1xf32>
      %12 = tpu.reciprocal %11 {approx = true} : vector<32x1xf32> -> vector<32x1xf32>
      %13 = arith.mulf %11, %12 : vector<32x1xf32>
      %cst = arith.constant 2.000000e+00 : f32
      %14 = vector.broadcast %cst : f32 to vector<32x1xf32>
      %15 = arith.subf %14, %13 : vector<32x1xf32>
      %16 = arith.mulf %12, %15 : vector<32x1xf32>
      %c0_6 = arith.constant 0 : index
      %c0_7 = arith.constant 0 : index
      %17 = vector.load %arg18[%c0_6, %c0_7] : memref<32x16xf32, #tpu.memory_space<vmem>>, vector<32x16xf32>
      %18 = vector.broadcast %16 : vector<32x1xf32> to vector<32x16xf32>
      %19 = arith.mulf %17, %18 : vector<32x16xf32>
      %20 = vector.extract_strided_slice %19 {offsets = [0, 0], sizes = [8, 16], strides = [1, 1]} : vector<32x16xf32> to vector<8x16xf32>
      %21 = vector.extract_strided_slice %19 {offsets = [8, 0], sizes = [8, 16], strides = [1, 1]} : vector<32x16xf32> to vector<8x16xf32>
      %22 = vector.extract_strided_slice %19 {offsets = [16, 0], sizes = [8, 16], strides = [1, 1]} : vector<32x16xf32> to vector<8x16xf32>
      %23 = vector.extract_strided_slice %19 {offsets = [24, 0], sizes = [8, 16], strides = [1, 1]} : vector<32x16xf32> to vector<8x16xf32>
      %24 = tpu.concatenate %20, %21, %22, %23 in 1 : vector<8x16xf32>, vector<8x16xf32>, vector<8x16xf32>, vector<8x16xf32> -> vector<8x64xf32>
      %c0_8 = arith.constant 0 : index
      %c0_9 = arith.constant 0 : index
      %25 = vector.load %arg13[%c0_8, %c0_9] : memref<64x64xf32, #tpu.memory_space<vmem>>, vector<64x64xf32>
      %cst_10 = arith.constant dense<0.000000e+00> : vector<8x64xf32>
      %26 = tpu.matmul %24, %25, %cst_10 {dimension_numbers = #tpu.dot_dimension_numbers<[1], [0], [0], [1], [0, 0, 1, 1], [], []>} : vector<8x64xf32>, vector<64x64xf32>, vector<8x64xf32> -> vector<8x64xf32>
      %c0_11 = arith.constant 0 : index
      %c0_12 = arith.constant 0 : index
      %c0_13 = arith.constant 0 : index
      %27 = vector.load %arg3[%c0_11, %c0_12, %c0_13] : memref<1x8x64xf32, #tpu.memory_space<vmem>>, vector<1x8x64xf32>
      %28 = vector.shape_cast %27 : vector<1x8x64xf32> to vector<8x64xf32>
      %29 = arith.addf %28, %26 : vector<8x64xf32>
      %c0_14 = arith.constant 0 : index
      %c0_15 = arith.constant 0 : index
      %c0_16 = arith.constant 0 : index
      %30 = vector.load %arg14[%c0_14, %c0_15, %c0_16] : memref<1x8x64xf32, #tpu.memory_space<vmem>>, vector<1x8x64xf32>
      %31 = vector.shape_cast %30 : vector<1x8x64xf32> to vector<8x64xf32>
      %32 = vector.shape_cast %29 : vector<8x64xf32> to vector<1x8x64xf32>
      tpu.vector_store %arg14[%c0_14, %c0_15, %c0_16], %32 {strides = array<i32>} : memref<1x8x64xf32, #tpu.memory_space<vmem>>, vector<1x8x64xf32>,
    } else {
    }
    return
  }
  func.func @transform_0(%arg0: i32, %arg1: i32, %arg2: i32) -> (i32, i32, i32) {
    %c0_i32 = arith.constant 0 : i32
    %c0_i32_0 = arith.constant 0 : i32
    return %arg0, %arg1, %c0_i32 : i32, i32, i32
  }
  func.func @transform_1(%arg0: i32, %arg1: i32, %arg2: i32) -> (i32, i32, i32) {
    %c2_i32 = arith.constant 2 : i32
    %0 = arith.subi %arg1, %c2_i32 : i32
    %1 = arith.addi %0, %arg2 : i32
    %c0_i32 = arith.constant 0 : i32
    %2 = arith.maxsi %1, %c0_i32 : i32
    %c0_i32_0 = arith.constant 0 : i32
    %c0_i32_1 = arith.constant 0 : i32
    return %arg0, %2, %c0_i32_0 : i32, i32, i32
  }
  func.func @transform_2(%arg0: i32, %arg1: i32, %arg2: i32) -> (i32, i32) {
    %c0_i32 = arith.constant 0 : i32
    %c0_i32_0 = arith.constant 0 : i32
    return %arg1, %c0_i32 : i32, i32
  }
  func.func @transform_3(%arg0: i32, %arg1: i32, %arg2: i32) -> (i32, i32) {
    %c0_i32 = arith.constant 0 : i32
    %c0_i32_0 = arith.constant 0 : i32
    return %arg1, %c0_i32 : i32, i32
  }
  func.func @transform_4(%arg0: i32, %arg1: i32, %arg2: i32) -> (i32, i32) {
    %c2_i32 = arith.constant 2 : i32
    %0 = arith.subi %arg1, %c2_i32 : i32
    %1 = arith.addi %0, %arg2 : i32
    %c0_i32 = arith.constant 0 : i32
    %2 = arith.maxsi %1, %c0_i32 : i32
    %c0_i32_0 = arith.constant 0 : i32
    %c0_i32_1 = arith.constant 0 : i32
    return %2, %c0_i32_0 : i32, i32
  }
  func.func @transform_5(%arg0: i32, %arg1: i32, %arg2: i32) -> (i32, i32) {
    %c2_i32 = arith.constant 2 : i32
    %0 = arith.subi %arg1, %c2_i32 : i32
    %1 = arith.addi %0, %arg2 : i32
    %c0_i32 = arith.constant 0 : i32
    %2 = arith.maxsi %1, %c0_i32 : i32
    %c0_i32_0 = arith.constant 0 : i32
    %c0_i32_1 = arith.constant 0 : i32
    return %2, %c0_i32_0 : i32, i32
  }
  func.func @transform_6(%arg0: i32, %arg1: i32, %arg2: i32) -> (i32, i32) {
    %c0_i32 = arith.constant 0 : i32
    %c0_i32_0 = arith.constant 0 : i32
    %c0_i32_1 = arith.constant 0 : i32
    return %c0_i32, %c0_i32_0 : i32, i32
  }
  func.func @transform_7(%arg0: i32, %arg1: i32, %arg2: i32) -> (i32, i32) {
    %c0_i32 = arith.constant 0 : i32
    %c0_i32_0 = arith.constant 0 : i32
    %c0_i32_1 = arith.constant 0 : i32
    return %c0_i32, %c0_i32_0 : i32, i32
  }
  func.func @transform_8(%arg0: i32, %arg1: i32, %arg2: i32) -> (i32, i32) {
    %c0_i32 = arith.constant 0 : i32
    %c0_i32_0 = arith.constant 0 : i32
    %c0_i32_1 = arith.constant 0 : i32
    return %c0_i32, %c0_i32_0 : i32, i32
  }
  func.func @transform_9(%arg0: i32, %arg1: i32, %arg2: i32) -> (i32, i32) {
    %c0_i32 = arith.constant 0 : i32
    %c0_i32_0 = arith.constant 0 : i32
    %c0_i32_1 = arith.constant 0 : i32
    return %c0_i32, %c0_i32_0 : i32, i32
  }
  func.func @transform_10(%arg0: i32, %arg1: i32, %arg2: i32) -> (i32, i32) {
    %c0_i32 = arith.constant 0 : i32
    %c0_i32_0 = arith.constant 0 : i32
    %c0_i32_1 = arith.constant 0 : i32
    return %c0_i32, %c0_i32_0 : i32, i32
  }
  func.func @transform_11(%arg0: i32, %arg1: i32, %arg2: i32) -> (i32, i32, i32) {
    %c0_i32 = arith.constant 0 : i32
    %c0_i32_0 = arith.constant 0 : i32
    return %arg0, %arg1, %c0_i32 : i32, i32, i32
  }
}

</mosaic_0001>

<bundles_post_ra>
// kernel: tpu_custom_call.1
= control target key start
LH: loop header
LB: loop body
LE: loop exit
PB: predicated region body
PF: predicated region fallthrough
CT: control target
= control target key end

     0   :  { %s3460_s0 = inlined_call_operand.vmem [shape: f32[2,32,64], index: 0, kind: input, shape index: {}]   ;;  %s3461_s1 = inlined_call_operand.vmem [shape: f32[2,32,64], index: 1, kind: input, shape index: {}]   ;;  %s3462_s2 = inlined_call_operand.hbm [shape: f32[32,64], index: 2, kind: input, shape index: {}]   ;;  %s3463_s3 = inlined_call_operand.hbm [shape: f32[32,64], index: 3, kind: input, shape index: {}]   ;;  %s3464_s4 = inlined_call_operand.hbm [shape: f32[32,32], index: 4, kind: input, shape index: {}]   ;;  %s3465_s5 = inlined_call_operand.hbm [shape: f32[32,32], index: 5, kind: input, shape index: {}]   ;;  %s3466_s6 = inlined_call_operand.vmem [shape: f32[1,64], index: 6, kind: input, shape index: {}]   ;;  %s3467_s7 = inlined_call_operand.vmem [shape: f32[64,64], index: 7, kind: input, shape index: {}]   ;;  %s3468_s8 = inlined_call_operand.vmem [shape: f32[64,32], index: 8, kind: input, shape index: {}]   ;;  %s3469_s9 = inlined_call_operand.vmem [shape: f32[64,32], index: 9, kind: input, shape index: {}]   ;;  %s3470_s10 = inlined_call_operand.hbm [shape: f32[64,64], index: 10, kind: input, shape index: {}]   ;;  %s3471_s11 = inlined_call_operand.hbm [shape: f32[2,32,64], index: 11, kind: output, shape index: {}]  }
   0x1   :  { %3500 = sst [smem:[#allocation34_spill]] %s3460_s0 }
   0x2   :  { %3501 = sst [smem:[#allocation35_spill]] %s3461_s1 }
   0x3   :  { %3502 = sst [smem:[#allocation36_spill]] %s3462_s2 }
   0x4   :  { %3503 = sst [smem:[#allocation37_spill]] %s3463_s3 }
   0x5   :  { %3504 = sst [smem:[#allocation38_spill]] %s3464_s4 }
   0x6   :  { %3505 = sst [smem:[#allocation39_spill]] %s3465_s5 }
   0x7   :  { %3506 = sst [smem:[#allocation40_spill]] %s3466_s6 }
   0x8   :  { %3507 = sst [smem:[#allocation41_spill]] %s3467_s7 }
   0x9   :  { %3508 = sst [smem:[#allocation42_spill]] %s3468_s8 }
   0xa   :  { %3509 = sst [smem:[#allocation43_spill]] %s3469_s9 }
   0xb   :  { %3510 = sst [smem:[#allocation44_spill]] %s3470_s10 }
   0xc   :  { %3511 = sst [smem:[#allocation45_spill]] %s3471_s11 }
   0xd   :  { %16 = vsyncpa [#allocation7], 0 }
   0xe   :  { %18 = vsyncpa [#allocation7 + $0x1], 0 }
   0xf   :  { %19 = vsyncpa [#allocation10], 0 }
  0x10   :  { %21 = vsyncpa [#allocation10 + $0x1], 0 }
  0x11   :  { %22 = vsyncpa [#allocation13], 0 }
  0x12   :  { %24 = vsyncpa [#allocation13 + $0x1], 0 }
  0x13   :  { %25 = vsyncpa [#allocation8], 0 }
  0x14   :  { %27 = vsyncpa [#allocation8 + $0x1], 0  ;;  %s2803_s17 = smov 0   ;;  %s2805_s18 = smov 0  }
  0x15   :  { %s2807_s19 = smov 0   ;;  %s2809_s20 = smov 0  }
  0x16   :  { %s2811_s21 = smov 0   ;;  %s2813_s22 = smov 0  }
  0x17   :  { %s2815_s23 = smov 0   ;;  %s2817_s24 = smov 0  }
  0x18   :  { %s2819_s25 = smov 0   ;;  %s2821_s26 = smov 0  }
  0x19   :  { %s2823_s27 = smov 0   ;;  %s2825_s28 = smov 0  }
  0x1a   :  { %s2827_s29 = smov 0   ;;  %s2829_s30 = smov 0  }
  0x1b   :  { %s2831_s12 = smov 0   ;;  %s2833_s13 = smov 0  }
  0x1c LB: > { %3512 = sst [smem:[#allocation22_spill]] %s2649_s17  ;;  %s2882_s14 = sadd.s32 4294967295, %s2709_s13   ;;  %s2709_s13 = sphi %s2833_s13, %s33_s13   ;;  %s2705_s12 = sphi %s2831_s12, %s3587_s12   ;;  %s2701_s30 = sphi %s2829_s30, %s3586_s30   ;;  %s2697_s29 = sphi %s2827_s29, %s3599_s29   ;;  %s2693_s28 = sphi %s2825_s28, %s3584_s28   ;;  %s2689_s27 = sphi %s2823_s27, %s3598_s27   ;;  %s2685_s26 = sphi %s2821_s26, %s3597_s26   ;;  %s2681_s25 = sphi %s2819_s25, %s3596_s25   ;;  %s2677_s24 = sphi %s2817_s24, %s3595_s24   ;;  %s2673_s23 = sphi %s2815_s23, %s3594_s23   ;;  %s2669_s22 = sphi %s2813_s22, %s3593_s22   ;;  %s2665_s21 = sphi %s2811_s21, %s3592_s21   ;;  %s2661_s20 = sphi %s2809_s20, %s3591_s20   ;;  %s2657_s19 = sphi %s2807_s19, %s3590_s19   ;;  %s2653_s18 = sphi %s2805_s18, %s3589_s18   ;;  %s2649_s17 = sphi %s2803_s17, %s3582_s17  }
  0x1d   : > { %3513 = sst [smem:[#allocation23_spill]] %s2653_s18  ;;  %s1898_s15 = sadd.s32 4294967294, %s2709_s13  }
  0x1e   : > { %3514 = sst [smem:[#allocation24_spill]] %s2685_s26  ;;  %p3481_p0 = scmp.eq.s32.totalorder %s2882_s14, 0 }
  0x1f   : > { %3515 = sst [smem:[#allocation25_spill]] %s2689_s27  ;;  %p196_p1 = scmp.ne.s32.totalorder %s2665_s21, %s2661_s20 }
  0x20   : > { %3516 = sst [smem:[#allocation26_spill]] %s2693_s28  ;;  %p360_p2 = scmp.ne.s32.totalorder %s2657_s19, %s2653_s18 }
  0x21   : > { %3517 = sst [smem:[#allocation27_spill]] %s2701_s30  ;;  %p2892_p3 = por %p196_p1, %p3481_p0 }
  0x22   : > { %3518 = sst [smem:[#allocation28_spill]] %s2705_s12  ;;  %p361_p4 = scmp.eq.s32.totalorder %s2882_s14, 23 }
  0x23   : > { %s3519_s11 = scalar_select %p2892_p3, 1, 0 }
  0x24   : > { %p366_p5 = scmp.ne.s32.totalorder %s2653_s18, %s2649_s17  ;;  %p367_p6 = scmp.eq.s32.totalorder %s1898_s15, 23 }
  0x25   : > { %p2899_p7 = por %p361_p4, %p360_p2  ;;  %p1905_p8 = scmp.ge.s32.totalorder %s2709_s13, 1 }
  0x26   : > { %p2904_p9 = por %p367_p6, %p366_p5  ;;  %p374_p10 = scmp.lt.s32.totalorder %s2709_s13, 25 }
  0x27   : > { %s3520_s9 = scalar_select %p2899_p7, 1, 0 }
  0x28   : > { %s3522_s8 = scalar_select %p2904_p9, 1, 0 }
  0x29   : > { %3521 = sst [smem:[#allocation29_spill]] %s3520_s9  ;;  %p2909_p11 = pnand %p1905_p8, %p374_p10 }
  0x2a   : > { %3523 = sst [smem:[#allocation30_spill]] %s3522_s8  ;;  %s2711_s16 = smov [#allocation14]  }
  0x2b   : > { %s3524_s20 = scalar_select %p2909_p11, 1, 0 }
  0x2c   : > { %s398_s6 = sshll.u32 %s2711_s16, 4  ;;  %p2171_p12 = pneg %p2909_p11  ;;  %s399_s6 = int_to_ptr.vmem [resolvable:$true] %s398_s6 }
  0x2d   : > { %s3526_s10 = sld [smem:[#allocation44_spill]] }
  0x2e   : > { %p2917_p13 = pnand %p2171_p12, %p3481_p0 }
  0x30   : > { %p2385_p2 = pneg %p2917_p13 }
  0x33   : > { %s2383_s8 = scalar_lea.hbm %s3526_s10, 1024 }
  0x34   : > { %p2384_p1 = scmp.ne.s32.totalorder %s3526_s10, %s2383_s8  ;;  %p2390_p6 = scmp.lt.u32.totalorder %s2383_s8, %s3526_s10 }
  0x36   : > { %p2386_p4 = pnand %p2385_p2, %p2384_p1 }
  0x38   : > { %p2387_p5 = pneg %p2386_p4 }
  0x3a   : > { %p2392_p8 = pnand %p2390_p6, %p2387_p5 }
  0x3c   : > { %2395 = shalt.err (!%p2392_p8)
}
  0x3d   : > { %s2396_s26 = scalar_lea.vmem %s399_s6, 1024  ;;  %p2404_p9 = scmp.lt.s32.totalorder %s399_s6, %s399_s6 }
  0x3e   : > { %p2397_p10 = scmp.ne.s32.totalorder %s399_s6, %s2396_s26  ;;  %p2405_p7 = scmp.lt.s32.totalorder %s2396_s26, %s2396_s26 }
  0x40   : > { %p2399_p12 = pnand %p2397_p10, %p2385_p2  ;;  %p2406_p3 = por %p2405_p7, %p2404_p9 }
  0x42   : > { %p2400_p0 = pneg %p2399_p12 }
  0x44   : > { %p2407_p11 = pnand %p2406_p3, %p2400_p0 }
  0x46   : > { %2410 = shalt.err (!%p2407_p11)
}
  0x47   : > { %s2712_s1 = smov 128   ;;  %s2713_s0 = smov 8  }
  0x48   : > { %2174 = dma.hbm_to_vmem [thread:$0]  (!%p2917_p13), %s3526_s10, 1024, %s399_s6, [#allocation13], %s2712_s1, %s2712_s1, %s2713_s0  }
  0x49   : > { %p130_p0 = scmp.ne.s32.totalorder %s2681_s25, %s2677_s24  ;;  %p131_p3 = scmp.eq.s32.totalorder %s2709_s13, 0 }
  0x4a   : > { %p136_p7 = scmp.ne.s32.totalorder %s2677_s24, %s2673_s23  ;;  %p190_p9 = scmp.ne.s32.totalorder %s2669_s22, %s2665_s21 }
  0x4b   : > { %p2193_p11 = scmp.lt.s32.totalorder %s2709_s13, 24  ;;  %p132_p1 = por %p131_p3, %p130_p0 }
  0x4c   : > { %p3527_p2 = scmp.eq.s32.totalorder %s2882_s14, 0  ;;  %p192_p5 = por %p190_p9, %p131_p3 }
  0x4d   : > { %s3485_s15 = sand.u32 1, %s2681_s25   ;;  %s3487_s6 = sshll.u32 %s2701_s30, 7 }
  0x4e   : > { %p2949_p4 = por %p3527_p2, %p136_p7  ;;  %s2956_s16 = sshll.u32 %s3485_s15, 3 }
  0x4f   : > { %p2959_p13 = pnand %p2193_p11, %p132_p1  ;;  %s3489_s23 = sand.u32 1, %s2709_s13  }
  0x50   : > { %s3528_s26 = scalar_select %p2949_p4, 1, 0 }
  0x51   : > { %s3530_s3 = sld [smem:[#allocation37_spill]]  ;;  %s464_s17 = scalar_lea.vmem [#allocation9], %s2956_s16 }
  0x52   : > { %s471_s9 = sshll.u32 %s464_s17, 4  ;;  %p2972_p6 = pnand %p2193_p11, %p192_p5  ;;  %s2976_s9 = int_to_ptr.vmem [resolvable:$true] %s471_s9 }
  0x53   : > { %s2980_s10 = scalar_lea.sflag [#allocation10], %s3489_s23  ;;  %p2413_p10 = pneg %p2959_p13 }
  0x54   : > { %s3531_s15 = scalar_select %p2972_p6, 1, 0 }
  0x57   : > { %s2969_s8 = scalar_lea.hbm %s3530_s3, %s3487_s6  ;;  %s2416_s17 = scalar_lea.hbm %s3530_s3, 512 }
  0x58   : > { %s2411_s27 = scalar_lea.hbm %s2969_s8, 128  ;;  %p2417_p3 = scmp.lt.u32.totalorder %s2969_s8, %s3530_s3 }
  0x59   : > { %p2412_p8 = scmp.ne.s32.totalorder %s2969_s8, %s2411_s27  ;;  %p2418_p7 = scmp.lt.u32.totalorder %s2416_s17, %s2411_s27 }
  0x5a   : > { %p2420_p11 = scmp.lt.u32.totalorder %s2411_s27, %s2969_s8 }
  0x5b   : > { %p2414_p12 = pnand %p2413_p10, %p2412_p8  ;;  %p2419_p9 = por %p2418_p7, %p2417_p3 }
  0x5d   : > { %p2415_p0 = pneg %p2414_p12  ;;  %p2421_p1 = por %p2420_p11, %p2419_p9 }
  0x5f   : > { %p2422_p2 = pnand %p2421_p1, %p2415_p0 }
  0x61   : > { %2425 = shalt.err (!%p2422_p2)
}
  0x62   : > { %s2426_s23 = scalar_lea.vmem %s2976_s9, 128  ;;  %s2714_s0 = smov [#allocation9]  }
  0x63   : > { %p2427_p5 = scmp.ne.s32.totalorder %s2976_s9, %s2426_s23  ;;  %s2431_s7 = sshll.u32 %s2714_s0, 4  ;;  %s2432_s7 = int_to_ptr.vmem [resolvable:$false] %s2431_s7 }
  0x64   : > { %s2433_s28 = scalar_lea.vmem %s2432_s7, 256  ;;  %p2434_p4 = scmp.lt.s32.totalorder %s2976_s9, %s2432_s7 }
  0x65   : > { %p2429_p8 = pnand %p2427_p5, %p2413_p10  ;;  %p2435_p3 = scmp.lt.s32.totalorder %s2433_s28, %s2426_s23 }
  0x67   : > { %p2430_p12 = pneg %p2429_p8  ;;  %p2436_p7 = por %p2435_p3, %p2434_p4 }
  0x69   : > { %p2437_p9 = pnand %p2436_p7, %p2430_p12 }
  0x6b   : > { %2440 = shalt.err (!%p2437_p9)
}
  0x6c   : > { %2181 = dma.hbm_to_vmem [thread:$0]  (!%p2959_p13), %s2969_s8, 128, %s2976_s9, %s2980_s10  }
  0x6d   : > { %s3532_s27 = sshll.u32 %s2701_s30, 7  ;;  %s3533_s2 = sld [smem:[#allocation36_spill]] }
  0x6e   : > { %s446_s23 = scalar_lea.vmem [#allocation6], %s2956_s16  ;;  %s3534_s28 = sand.u32 1, %s2681_s25  }
  0x6f   : > { %s453_s7 = sshll.u32 %s446_s23, 4  ;;  %s443_s3 = scalar_lea.sflag [#allocation7], %s3534_s28  ;;  %s454_s7 = int_to_ptr.vmem [resolvable:$true] %s453_s7 }
  0x73   : > { %s3013_s0 = scalar_lea.hbm %s3533_s2, %s3532_s27  ;;  %s2446_s27 = scalar_lea.hbm %s3533_s2, 512 }
  0x74   : > { %s2441_s18 = scalar_lea.hbm %s3013_s0, 128  ;;  %p2447_p1 = scmp.lt.u32.totalorder %s3013_s0, %s3533_s2 }
  0x75   : > { %p2442_p4 = scmp.ne.s32.totalorder %s3013_s0, %s2441_s18  ;;  %p2448_p2 = scmp.lt.u32.totalorder %s2446_s27, %s2441_s18 }
  0x76   : > { %p2450_p8 = scmp.lt.u32.totalorder %s2441_s18, %s3013_s0 }
  0x77   : > { %p2444_p0 = pnand %p2442_p4, %p2413_p10  ;;  %p2449_p5 = por %p2448_p2, %p2447_p1 }
  0x79   : > { %p2445_p11 = pneg %p2444_p0  ;;  %p2451_p12 = por %p2450_p8, %p2449_p5 }
  0x7b   : > { %p2452_p3 = pnand %p2451_p12, %p2445_p11 }
  0x7d   : > { %2455 = shalt.err (!%p2452_p3)
}
  0x7e   : > { %s2456_s16 = scalar_lea.vmem %s454_s7, 128  ;;  %s2715_s23 = smov [#allocation6]  }
  0x7f   : > { %p2457_p7 = scmp.ne.s32.totalorder %s454_s7, %s2456_s16  ;;  %s2461_s28 = sshll.u32 %s2715_s23, 4  ;;  %s2462_s28 = int_to_ptr.vmem [resolvable:$false] %s2461_s28 }
  0x80   : > { %s2463_s9 = scalar_lea.vmem %s2462_s28, 256  ;;  %p2464_p0 = scmp.lt.s32.totalorder %s454_s7, %s2462_s28 }
  0x81   : > { %p2459_p9 = pnand %p2457_p7, %p2413_p10  ;;  %p2465_p6 = scmp.lt.s32.totalorder %s2463_s9, %s2456_s16 }
  0x83   : > { %p2460_p4 = pneg %p2459_p9  ;;  %p2466_p1 = por %p2465_p6, %p2464_p0 }
  0x85   : > { %p2467_p2 = pnand %p2466_p1, %p2460_p4 }
  0x87   : > { %2470 = shalt.err (!%p2467_p2)
}
  0x88   : > { %2178 = dma.hbm_to_vmem [thread:$0]  (!%p2959_p13), %s3013_s0, 128, %s454_s7, %s443_s3  }
  0x89   : > { %s45_s18 = sadd.s32 1, %s2697_s29  ;;  %s52_s8 = sadd.s32 1, %s2705_s12 }
  0x8a   : > { %p46_p10 = scmp.ge.s32.totalorder %s45_s18, 3  ;;  %s1901_s27 = sadd.s32 4294967294, %s2701_s30 }
  0x8b   : > { %s173_s6 = sadd.s32 %s2697_s29, %s1901_s27  ;;  %s3536_s1 = sadd.s32 1, %s2701_s30 }
  0x8c   : > { %s3601_s18 = smov (%p46_p10, %s45_s18), 0  ;;  %s3603_s1 = smov (!%p46_p10, %s3536_s1), %s2701_s30 }
  0x8d   : > { %3535 = sst [smem:[#allocation31_spill]] %s3601_s18  ;;  %p174_p6 = scmp.gt.s32.totalorder %s173_s6, 0 }
  0x8e   : > { %s480_s16 = sand.u32 1, %s2669_s22   ;;  %p50_p11 = scmp.ge.s32.totalorder %s3603_s1, 4 }
  0x8f   : > { %s3048_s23 = sshll.u32 %s480_s16, 3  ;;  %s3605_s6 = smov (!%p174_p6, %s173_s6), 0 }
  0x90   : > { %s3607_s1 = smov (%p50_p11, %s3603_s1), 0  ;;  %s3609_s8 = smov (!%p50_p11, %s52_s8), %s2705_s12 }
  0x91   : > { %3537 = sst [smem:[#allocation32_spill]] %s3607_s1  ;;  %s120_s3 = ssub.s32 %s2701_s30, %s3607_s1 }
  0x92   : > { %s1902_s0 = sadd.s32 4294967294, %s3607_s1  ;;  %p54_p13 = scmp.ge.s32.totalorder %s3609_s8, 2 }
  0x93   : > { %p121_p5 = scmp.eq.s32.totalorder %s120_s3, 0  ;;  %s177_s7 = sadd.s32 %s1902_s0, %s3601_s18 }
  0x94   : > { %s3611_s8 = smov (%p54_p13, %s3609_s8), 0  ;;  %s3539_s28 = sadd.s32 1, %s2681_s25 }
  0x95   : > { %3538 = sst [smem:[#allocation33_spill]] %s3611_s8  ;;  %p178_p8 = scmp.gt.s32.totalorder %s177_s7, 0 }
  0x96   : > { %s3064_s9 = scalar_select %p121_p5, %s2681_s25, %s3539_s28  }
  0x97   : > { %s345_s27 = ssub.s32 %s2705_s12, %s3611_s8  ;;  %s1914_s17 = sshll.u32 %s3605_s6, 7 }
  0x98   : > { %s347_s16 = sor.u32 %s345_s27, %s120_s3  ;;  %s3613_s7 = smov (!%p178_p8, %s177_s7), 0 }
  0x99   : > { %p348_p12 = scmp.eq.s32.totalorder %s347_s16, 0  ;;  %s3540_s4 = sld [smem:[#allocation38_spill]] }
  0x9a   : > { %s180_s18 = ssub.s32 %s3605_s6, %s3613_s7  ;;  %s482_s28 = scalar_lea.vmem [#allocation11], %s3048_s23 }
  0x9b   : > { %s493_s30 = sshll.u32 %s482_s28, 4  ;;  %p181_p3 = scmp.eq.s32.totalorder %s180_s18, 0  ;;  %s3078_s30 = int_to_ptr.vmem [resolvable:$true] %s493_s30 }
  0x9c   : > { %s3541_s3 = sadd.s32 1, %s2657_s19  ;;  %s3542_s16 = sadd.s32 1, %s2669_s22 }
  0x9d   : > { %s3083_s27 = scalar_select %p348_p12, %s2657_s19, %s3541_s3  }
  0x9e   : > { %s3088_s8 = scalar_select %p181_p3, %s2669_s22, %s3542_s16  }
  0x9f   : > { %s3074_s0 = scalar_lea.hbm %s3540_s4, %s1914_s17  ;;  %p3543_p9 = scmp.ne.s32.totalorder %s3531_s15, 0 }
  0xa0   : > { %s2471_s12 = scalar_lea.hbm %s3074_s0, 128  ;;  %s2476_s18 = scalar_lea.hbm %s3540_s4, 512 }
  0xa1   : > { %p2472_p7 = scmp.ne.s32.totalorder %s3074_s0, %s2471_s12  ;;  %p2473_p4 = pneg %p3543_p9 }
  0xa2   : > { %p2477_p2 = scmp.lt.u32.totalorder %s3074_s0, %s3540_s4  ;;  %p2478_p10 = scmp.lt.u32.totalorder %s2476_s18, %s2471_s12 }
  0xa3   : > { %p2474_p0 = pnand %p2473_p4, %p2472_p7  ;;  %p2480_p11 = scmp.lt.u32.totalorder %s2471_s12, %s3074_s0 }
  0xa4   : > { %p2479_p6 = por %p2478_p10, %p2477_p2 }
  0xa5   : > { %p2475_p1 = pneg %p2474_p0 }
  0xa6   : > { %p2481_p13 = por %p2480_p11, %p2479_p6 }
  0xa8   : > { %p2482_p5 = pnand %p2481_p13, %p2475_p1 }
  0xaa   : > { %2485 = shalt.err (!%p2482_p5)
}
  0xab   : > { %s2486_s3 = scalar_lea.vmem %s3078_s30, 128  ;;  %s2716_s16 = smov [#allocation11]  }
  0xac   : > { %p2487_p8 = scmp.ne.s32.totalorder %s3078_s30, %s2486_s3  ;;  %s2491_s2 = sshll.u32 %s2716_s16, 4  ;;  %s2492_s2 = int_to_ptr.vmem [resolvable:$false] %s2491_s2 }
  0xad   : > { %s2493_s1 = scalar_lea.vmem %s2492_s2, 256  ;;  %p2494_p7 = scmp.lt.s32.totalorder %s3078_s30, %s2492_s2 }
  0xae   : > { %p2489_p12 = pnand %p2487_p8, %p2473_p4  ;;  %p2495_p0 = scmp.lt.s32.totalorder %s2493_s1, %s2486_s3 }
  0xb0   : > { %p2490_p3 = pneg %p2489_p12  ;;  %p2496_p2 = por %p2495_p0, %p2494_p7 }
  0xb2   : > { %p2497_p10 = pnand %p2496_p2, %p2490_p3 }
  0xb4   : > { %2500 = shalt.err (!%p2497_p10)
}
  0xb5   : > { %2184 = dma.hbm_to_vmem [thread:$0]  (!%p3543_p9), %s3074_s0, 128, %s3078_s30, %s2980_s10  }
  0xb6   : > { %s3544_s5 = sld [smem:[#allocation39_spill]]  ;;  %s504_s28 = scalar_lea.vmem [#allocation12], %s3048_s23 }
  0xb7   : > { %s515_s3 = sshll.u32 %s504_s28, 4  ;;  %s3545_s16 = sand.u32 1, %s2709_s13   ;;  %s516_s3 = int_to_ptr.vmem [resolvable:$true] %s515_s3 }
  0xb8   : > { %s501_s2 = scalar_lea.sflag [#allocation13], %s3545_s16 }
  0xbc   : > { %s3121_s7 = scalar_lea.hbm %s3544_s5, %s1914_s17  ;;  %s2506_s6 = scalar_lea.hbm %s3544_s5, 512 }
  0xbd   : > { %s2501_s1 = scalar_lea.hbm %s3121_s7, 128  ;;  %p2507_p13 = scmp.lt.u32.totalorder %s3121_s7, %s3544_s5 }
  0xbe   : > { %p2502_p1 = scmp.ne.s32.totalorder %s3121_s7, %s2501_s1  ;;  %p2508_p5 = scmp.lt.u32.totalorder %s2506_s6, %s2501_s1 }
  0xbf   : > { %p2510_p12 = scmp.lt.u32.totalorder %s2501_s1, %s3121_s7 }
  0xc0   : > { %p2504_p6 = pnand %p2502_p1, %p2473_p4  ;;  %p2509_p8 = por %p2508_p5, %p2507_p13 }
  0xc2   : > { %p2505_p11 = pneg %p2504_p6  ;;  %p2511_p3 = por %p2510_p12, %p2509_p8 }
  0xc4   : > { %p2512_p7 = pnand %p2511_p3, %p2505_p11 }
  0xc6   : > { %2515 = shalt.err (!%p2512_p7)
}
  0xc7   : > { %s2516_s23 = scalar_lea.vmem %s516_s3, 128  ;;  %s2717_s12 = smov [#allocation12]  }
  0xc8   : > { %p2517_p0 = scmp.ne.s32.totalorder %s516_s3, %s2516_s23  ;;  %s2521_s18 = sshll.u32 %s2717_s12, 4  ;;  %s2522_s18 = int_to_ptr.vmem [resolvable:$false] %s2521_s18 }
  0xc9   : > { %s2523_s28 = scalar_lea.vmem %s2522_s18, 256  ;;  %p2524_p1 = scmp.lt.s32.totalorder %s516_s3, %s2522_s18 }
  0xca   : > { %p2519_p2 = pnand %p2517_p0, %p2473_p4  ;;  %p2525_p6 = scmp.lt.s32.totalorder %s2523_s28, %s2516_s23 }
  0xcc   : > { %p2520_p10 = pneg %p2519_p2  ;;  %p2526_p5 = por %p2525_p6, %p2524_p1 }
  0xce   : > { %p2527_p13 = pnand %p2526_p5, %p2520_p10 }
  0xd0   : > { %2530 = shalt.err (!%p2527_p13)
}
  0xd1   : > { %2187 = dma.hbm_to_vmem [thread:$0]  (!%p3543_p9), %s3121_s7, 128, %s516_s3, %s501_s2  }
  0xd2   : > { %p3546_p11 = scmp.ne.s32.totalorder %s3524_s20, 0 }
  0xd3   : > { %s526_s16 = sand.u32 (!%p3546_p11), 1, %s2677_s24   ;;  %p3547_p4 = scmp.ne.s32.totalorder (!%p3546_p11), %s3528_s26, 0 }
  0xd4   : > { %524 = sbr.rel (%p3546_p11) target bundleno = 2746 (0xaba), region = 64  ;;  %s3148_s1 = sshll.u32 (!%p3546_p11), %s526_s16, 3 }
  0xd5   : > { %s527_s10 = scalar_lea.sflag (!%p3546_p11), [#allocation7], %s526_s16 }
  0xdb   : > { %2624 = dma.done.wait (%p3547_p4), %s527_s10, 128  }
  0xdc   : > { %2626 = vsyncadd (%p3547_p4), %s527_s10, 4294967168  ;;  %s535_s15 = sand.u32 1, %s2882_s14  }
  0xdd   : > { %s536_s7 = scalar_lea.sflag [#allocation10], %s535_s15 }
  0xde   : > { %2628 = dma.done.wait (%p3547_p4), %s536_s7, 128  }
  0xdf   : > { %2630 = vsyncadd (%p3547_p4), %s536_s7, 4294967168  ;;  %s546_s3 = sand.u32 1, %s2665_s21   ;;  %p3548_p9 = scmp.ne.s32.totalorder %s3519_s11, 0 }
  0xe0   : > { %s3162_s2 = sshll.u32 %s546_s3, 3 }
  0xe1   : > { %2632 = dma.done.wait (%p3548_p9), %s536_s7, 128  }
  0xe2   : > { %2634 = vsyncadd (%p3548_p9), %s536_s7, 4294967168  ;;  %s554_s17 = scalar_lea.sflag [#allocation13], %s535_s15 }
  0xe3   : > { %2636 = dma.done.wait (%p3548_p9), %s554_s17, 128  }
  0xe4   : > { %2638 = vsyncadd (%p3548_p9), %s554_s17, 4294967168  ;;  %p3549_p8 = scmp.eq.s32.totalorder %s2882_s14, 0 }
  0xe6   : > { %2640 = dma.done.wait (%p3549_p8), [#allocation13], 1024   ;;  %p3550_p12 = pmov %p3549_p8 }
  0xe7   : > { %s3551_s26 = sld [smem:[#allocation23_spill]]  ;;  %s3552_s23 = sld [smem:[#allocation26_spill]] }
  0xe8   : > { %2642 = vsyncadd (%p3550_p12), [#allocation13], 4294966272  ;;  %s3553_s12 = sld [smem:[#allocation25_spill]]  ;;  %s3554_s18 = sld [smem:[#allocation24_spill]] }
  0xed   : > { %s3499_s28 = sand.u32 1, %s3551_s26   ;;  %p635_p3 = scmp.lt.s32.totalorder %s3552_s23, 1 }
  0xee   : > { %s3182_s16 = sshll.u32 %s3499_s28, 3  ;;  %p637_p7 = scmp.lt.s32.totalorder %s3553_s12, 3 }
  0xef   : > { %s1927_s11 = sadd.s32 4294967294, %s3553_s12  ;;  %s3615_s23 = smov (!%p635_p3, %s3552_s23), 1 }
  0xf0   : > { %s3617_s12 = smov (!%p637_p7, %s3553_s12), 3  ;;  %s1925_s14 = sshll.u32 %s3615_s23, 2 }
  0xf1   : > { %s3189_s10 = sadd.s32 %s3554_s18, %s1927_s11  ;;  %s640_s15 = sadd.s32 %s1925_s14, %s3617_s12 }
  0xf2   : > { %p645_p0 = scmp.gt.s32.totalorder %s3189_s10, 0  ;;  %s1926_s7 = sshll.u32 %s640_s15, 3 }
  0xf3   : > { %p1928_p2 = scmp.lt.s32.totalorder %s3189_s10, 3  ;;  %s3555_s26 = sld [smem:[#allocation34_spill]] }
  0xf4   : > { %s646_s0 = scalar_select %p645_p0, %s3189_s10, 0 }
  0xf5   : > { %s3556_s11 = sld [smem:[#allocation35_spill]]  ;;  %s634_s5 = scalar_lea.vmem [#allocation15], %s3182_s16 }
  0xf6   : > { %s3619_s0 = smov (!%p1928_p2, %s646_s0), 3  ;;  %p1936_p10 = scmp.ne.s32.totalorder %s3554_s18, 0 }
  0xf7   : > { %s652_s6 = sadd.s32 %s3619_s0, %s1925_s14  ;;  %vm690_vm0 = vcmask (!%p1936_p10), 523264   ;;  %s3557_s0 = sld [smem:[#allocation41_spill]] (!%p1936_p10)  ;;  %v2718_v6 = vmov (!%p1936_p10), 0.0|0.0   ;;  %vm673_vm1 = vcmask (!%p1936_p10), 7168   ;;  %v2719_v12 = vmov (!%p1936_p10), -1e+30  }
  0xf8   : > { %s1934_s20 = sshll.u32 %s652_s6, 3  ;;  %672 = sbr.rel (%p1936_p10) target bundleno = 879 (0x36f), region = 88  ;;  %2109 = vmatprep.subr.bf16.mxu0 (!%p1936_p10), %v2718_v6  ;;  %674 = vst.msk [vmem:[#allocation3] sm:$0xff] (!%p1936_p10), %vm673_vm1, %v2719_v12  ;;  %675 = vst.msk [vmem:[#allocation3 + $0x8] sm:$0xff] (!%p1936_p10), %vm673_vm1, %v2719_v12  ;;  %v2720_v13 = vmov (!%p1936_p10), 0.0   ;;  %vm2721_vm2 = vmmov (!%p1936_p10), 0  }
  0xf9   : > { %s3196_s28 = scalar_lea.vmem %s3555_s26, %s1926_s7  ;;  %676 = vst.msk [vmem:[#allocation3 + $0x10] sm:$0xff] (!%p1936_p10), %vm673_vm1, %v2719_v12  ;;  %677 = vst.msk [vmem:[#allocation3 + $0x18] sm:$0xff] (!%p1936_p10), %vm673_vm1, %v2719_v12  ;;  %2029 = vmatprep.mubr.msk.f32.mxu0 (!%p1936_p10), %vm2721_vm2, %v2720_v13  ;;  %vm682_vm3 = vcmask (!%p1936_p10), 130048   ;;  %s2722_s18 = smov (!%p1936_p10), 8   ;;  %vm798_vm4 = vcmask (!%p1936_p10), 64512   ;;  %vm801_vm5 = vcmask (!%p1936_p10), 195584  }
  0xfa   : > { %v687_v0 = vld [vmem:[%s3196_s28] sm:$0xff] (!%p1936_p10)  ;;  %678 = vst.msk [vmem:[#allocation4] sm:$0xff] (!%p1936_p10), %vm673_vm1, %v2720_v13  ;;  %679 = vst.msk [vmem:[#allocation4 + $0x8] sm:$0xff] (!%p1936_p10), %vm673_vm1, %v2720_v13  ;;  %s2723_s7 = smov (!%p1936_p10), 120   ;;  %vm803_vm6 = vcmask (!%p1936_p10), 261120   ;;  %vm805_vm7 = vcmask (!%p1936_p10), 326656  }
  0xfb   : > { %s3202_s4 = scalar_lea.vmem %s3556_s11, %s1934_s20  ;;  %v689_v1 = vmul.f32 (!%p1936_p10), %v687_v0, %v687_v0  ;;  %680 = vst.msk [vmem:[#allocation4 + $0x10] sm:$0xff] (!%p1936_p10), %vm673_vm1, %v2720_v13  ;;  %681 = vst.msk [vmem:[#allocation4 + $0x18] sm:$0xff] (!%p1936_p10), %vm673_vm1, %v2720_v13  ;;  %s3558_s20 = sld [smem:[#allocation40_spill]] (!%p1936_p10)  ;;  %vm807_vm8 = vcmask (!%p1936_p10), 392192   ;;  %vm809_vm9 = vcmask (!%p1936_p10), 457728  }
  0xfc   : > { %683 = vst.msk [vmem:[#allocation5] sm:$0xff] (!%p1936_p10), %vm682_vm3, %v2720_v13  ;;  %684 = vst.msk [vmem:[#allocation5 + $0x8] sm:$0xff] (!%p1936_p10), %vm682_vm3, %v2720_v13  ;;  %s3559_s3 = scalar_lea.vmem (!%p1936_p10), [#allocation6], %s3148_s1  ;;  %s3560_s17 = scalar_lea.vmem (!%p1936_p10), [#allocation9], %s3148_s1 }
  0xfd   : > { %v691_v2 = vsel (!%p1936_p10), %vm690_vm0, %v689_v1, 0.0  ;;  %v706_v3 = vld [vmem:[%s3557_s0] sm:$0xff] (!%p1936_p10)  ;;  %v707_v4 = vld [vmem:[%s3557_s0 + $0x8] sm:$0xff] (!%p1936_p10)  ;;  %v708_v7 = vld [vmem:[%s3557_s0 + $0x10] sm:$0xff] (!%p1936_p10)  ;;  %685 = vst.msk [vmem:[#allocation5 + $0x10] sm:$0xff] (!%p1936_p10), %vm682_vm3, %v2720_v13  ;;  %s2724_s26 = smov (!%p1936_p10), 112  }
  0xfe   : > { %692 = vadd.xlane.f32.xlu0 (!%p1936_p10), %v691_v2  ;;  %v2110_v5 = vpack.c.bf16 (!%p1936_p10), %v707_v4, %v706_v3  ;;  %v709_v8 = vld [vmem:[%s3557_s0 + $0x18] sm:$0xff] (!%p1936_p10)  ;;  %v710_v10 = vld [vmem:[%s3557_s0 + $0x20] sm:$0xff] (!%p1936_p10)  ;;  %v711_v11 = vld [vmem:[%s3557_s0 + $0x28] sm:$0xff] (!%p1936_p10)  ;;  %686 = vst.msk [vmem:[#allocation5 + $0x18] sm:$0xff] (!%p1936_p10), %vm682_vm3, %v2720_v13  ;;  %s2725_s23 = smov (!%p1936_p10), 96   ;;  %s2726_s11 = smov (!%p1936_p10), 80  }
  0xff   : > { %v2113_v9 = vpack.c.bf16 %v709_v8, %v708_v7  ;;  %v2116_v14 = vpack.c.bf16 %v711_v11, %v710_v10  ;;  %v712_v15 = vld [vmem:[%s3557_s0 + $0x30] sm:$0xff]  ;;  %v713_v16 = vld [vmem:[%s3557_s0 + $0x38] sm:$0xff]  ;;  %v787_v34 = vld [vmem:[%s3559_s3] sm:$0xff] }
 0x100   : > { %2111 = vmatpush3.bf16.msra.mxu0 %v2110_v5  ;;  %v2119_v17 = vpack.c.bf16 %v713_v16, %v712_v15  ;;  %v811_v35 = vld [vmem:[%s3560_s17] sm:$0xff] }
 0x101   : > { %2112 = vmatprep.subr.bf16.mxu0 %v2718_v6  ;;  %v1937_v22 = vld [vmem:[%s3558_s20] ss:$0 sm:$0xff] }
 0x104   : > { %2114 = vmatpush3.bf16.msra.mxu0 %v2113_v9 }
 0x105   : > { %2115 = vmatprep.subr.bf16.mxu0 %v2718_v6 }
 0x108   : > { %2117 = vmatpush3.bf16.msra.mxu0 %v2116_v14 }
 0x109   : > { %2118 = vmatprep.subr.bf16.mxu0 %v2718_v6 }
 0x10c   : > { %2120 = vmatpush3.bf16.msra.mxu0 %v2119_v17 }
 0x18b   : > { %v693_v18 = vpop.xlane.xlu0 %692 }
 0x18c   : > { %v695_v19 = vmul.f32 0.015625, %v693_v18 }
 0x18e   : > { %v696_v20 = vadd.f32 1e-05, %v695_v19 }
 0x190   : > { %2351 = vrsqrt.f32 %v696_v20 }
 0x19a   : > { %v2352_v21 = vpop.eup %2351 }
 0x19b   : > { %v698_v23 = vmul.f32 %v2352_v21, %v687_v0 }
 0x19d   : > { %v705_v24 = vmul.f32 %v1937_v22, %v698_v23 }
 0x19f   : > { %2030 = vmatmul.mubr.msk.f32.vlgmr.msra.gmra.mrb[0].mxu0 %vm690_vm0, %v705_v24 }
 0x272   : > { %v783_v25 = vpop.f32.mrb[0].mxu0 }
 0x273   : > { %v789_v26 = vsub.f32 0.0, %v783_v25  ;;  %795 = vrot.lane.b32.xlu1 %v783_v25, %s2722_s18  ;;  %v2031_v27 = vpop.f32.mrb[1].mxu0  ;;  %v788_v39 = vmul.f32 %v787_v34, %v783_v25 }
 0x275   : > { %791 = vrot.lane.b32.xlu0 %v789_v26, %s2723_s7 }
 0x2e5   : > { %v796_v28 = vpop.permute.xlu1 %795 }
 0x2e7   : > { %v792_v29 = vpop.permute.xlu0 %791 }
 0x2e8   : > { %v799_v30 = vsel %vm798_vm4, %v792_v29, %v796_v28 }
 0x2e9   : > { %v800_v31 = vsel %vm682_vm3, %v799_v30, %v792_v29 }
 0x2ea   : > { %v802_v32 = vsel %vm801_vm5, %v800_v31, %v796_v28 }
 0x2eb   : > { %v804_v33 = vsel %vm803_vm6, %v802_v32, %v792_v29 }
 0x2ec   : > { %v806_v36 = vsel %vm805_vm7, %v804_v33, %v796_v28 }
 0x2ed   : > { %v808_v37 = vsel %vm807_vm8, %v806_v36, %v792_v29 }
 0x2ee   : > { %v810_v38 = vsel %vm809_vm9, %v808_v37, %v796_v28 }
 0x2ef   : > { %v812_v40 = vmul.f32 %v811_v35, %v810_v38 }
 0x2f1   : > { %v813_v41 = vadd.f32 %v812_v40, %v788_v39 }
 0x2f3   : > { %816 = vrot.lane.b32.xlu1 %v813_v41, %s2724_s26  ;;  %814 = vst.msk [vmem:[#allocation2] sm:$0xff] %vm682_vm3, %v813_v41 }
 0x2f7   : > { %820 = vrot.lane.b32.xlu1 %v813_v41, %s2725_s23 }
 0x2fb   : > { %824 = vrot.lane.b32.xlu1 %v813_v41, %s2726_s11 }
 0x365   : > { %v817_v42 = vpop.permute.xlu1 %816 }
 0x366   : > { %819 = vst.msk [vmem:[#allocation2 + $0x8] sm:$0xff] %vm682_vm3, %v817_v42 }
 0x369   : > { %v821_v43 = vpop.permute.xlu1 %820 }
 0x36a   : > { %823 = vst.msk [vmem:[#allocation2 + $0x10] sm:$0xff] %vm682_vm3, %v821_v43 }
 0x36d   : > { %v825_v44 = vpop.permute.xlu1 %824 }
 0x36e   : > { %827 = vst.msk [vmem:[#allocation2 + $0x18] sm:$0xff] %vm682_vm3, %v825_v44 }
 0x36f PF: > { %p1939_p1 = scmp.lt.s32.totalorder %s3189_s10, 0 }
 0x370   : > { %v832_v45 = vld [vmem:[%s3202_s4] sm:$0xff] (!%p1939_p1)  ;;  %vm835_vm10 = vcmask (!%p1939_p1), 523264   ;;  %s3561_s15 = sld [smem:[#allocation42_spill]] (!%p1939_p1)  ;;  %s3562_s18 = sld [smem:[#allocation43_spill]] (!%p1939_p1)  ;;  %v2727_v53 = vmov (!%p1939_p1), 0.0|0.0   ;;  %vm2728_vm11 = vmmov (!%p1939_p1), 0   ;;  %v1031_v26 = vlaneseq (!%p1939_p1) }
 0x371   : > { %831 = sbr.rel (%p1939_p1) target bundleno = 2225 (0x8b1), region = 92  ;;  %v834_v46 = vmul.f32 (!%p1939_p1), %v832_v45, %v832_v45  ;;  %2121 = vmatprep.subr.bf16.mxu0 (!%p1939_p1), %v2727_v53  ;;  %2133 = vmatprep.subr.bf16.mxu1 (!%p1939_p1), %v2727_v53  ;;  %v2729_v1 = vmov (!%p1939_p1), 0.0   ;;  %s3564_s17 = sld [smem:[#allocation40_spill]] (!%p1939_p1)  ;;  %vm945_vm12 = vcmask (!%p1939_p1), 130048   ;;  %v1050_v17 = vld [vmem:[#allocation2] sm:$0xff] (!%p1939_p1)  ;;  %v2731_v23 = vmov (!%p1939_p1), 0  }
 0x372   : > { %2048 = vmatprep.mubr.msk.f32.mxu0 (!%p1939_p1), %vm2728_vm11, %v2729_v1  ;;  %2067 = vmatprep.mubr.msk.f32.mxu1 (!%p1939_p1), %vm2728_vm11, %v2729_v1  ;;  %s2730_s26 = smov (!%p1939_p1), 8   ;;  %s3565_s23 = sld [smem:[#allocation25_spill]] (!%p1939_p1)  ;;  %vm943_vm13 = vcmask (!%p1939_p1), 64512   ;;  %vm947_vm14 = vcmask (!%p1939_p1), 195584   ;;  %v1032_v34 = vshrl.u32 (!%p1939_p1), %v1031_v26, 7  ;;  %v1051_v38 = vld [vmem:[#allocation2 + $0x8] sm:$0xff] (!%p1939_p1) }
 0x373   : > { %v836_v47 = vsel (!%p1939_p1), %vm835_vm10, %v834_v46, 0.0  ;;  %2353 = vset.pattern.permute.xlu1 (!%p1939_p1), %v2731_v23  ;;  %s2732_s11 = smov (!%p1939_p1), 120   ;;  %2354 = vset.pattern.permute.xlu0 (!%p1939_p1), %v2731_v23  ;;  %s3566_s1 = scalar_lea.vmem (!%p1939_p1), [#allocation11], %s3162_s2  ;;  %v1286_v39 = vld [vmem:[#allocation2 + $0x10] sm:$0xff] (!%p1939_p1)  ;;  %v1037_v42 = vand.u32 (!%p1939_p1), 127, %v1031_v26  ;;  %vm1182_vm2 = vcmask (!%p1939_p1), 7168  }
 0x374   : > { %837 = vadd.xlane.f32.xlu0 (!%p1939_p1), %v836_v47  ;;  %v932_v27 = vld [vmem:[%s3566_s1] sm:$0xff] (!%p1939_p1)  ;;  %s3567_s12 = scalar_lea.vmem (!%p1939_p1), [#allocation12], %s3162_s2  ;;  %s2733_s14 = smov (!%p1939_p1), 112  }
 0x375   : > { %v949_v28 = vld [vmem:[%s3567_s12] sm:$0xff] (!%p1939_p1)  ;;  %s1944_s2 = sshll.u32 (!%p1939_p1), %s3189_s10, 3 }
 0x376   : > { %v851_v48 = vld [vmem:[%s3561_s15] sm:$0xff] (!%p1939_p1)  ;;  %v852_v49 = vld [vmem:[%s3561_s15 + $0x8] sm:$0xff] (!%p1939_p1)  ;;  %s3563_s7 = smov (!%p1939_p1), %s3562_s18  ;;  %v853_v55 = vld [vmem:[%s3561_s15 + $0x10] sm:$0xff] (!%p1939_p1)  ;;  %v1038_v43 = vstv (!%p1939_p1), %s1944_s2 }
 0x377   : > { %v952_v50 = vld [vmem:[%s3562_s18] sm:$0xff] (!%p1939_p1)  ;;  %v2122_v51 = vpack.c.bf16 (!%p1939_p1), %v852_v49, %v851_v48  ;;  %v953_v52 = vld [vmem:[%s3563_s7 + $0x8] sm:$0xff] (!%p1939_p1)  ;;  %v854_v56 = vld [vmem:[%s3561_s15 + $0x18] sm:$0xff] (!%p1939_p1)  ;;  %v1039_v44 = vadd.s32 (!%p1939_p1), %v1038_v43, %v1037_v42  ;;  %v2734_v48 = vmov (!%p1939_p1), -1e+30  }
 0x378   : > { %v2134_v54 = vpack.c.bf16 %v953_v52, %v952_v50  ;;  %v954_v57 = vld [vmem:[%s3563_s7 + $0x10] sm:$0xff]  ;;  %v2125_v58 = vpack.c.bf16 %v854_v56, %v853_v55  ;;  %v955_v59 = vld [vmem:[%s3563_s7 + $0x18] sm:$0xff]  ;;  %v855_v60 = vld [vmem:[%s3561_s15 + $0x20] sm:$0xff]  ;;  %s1943_s6 = sshll.u32 %s3565_s23, 3 }
 0x379   : > { %2123 = vmatpush3.bf16.msra.mxu0 %v2122_v51  ;;  %v856_v61 = vld [vmem:[%s3561_s15 + $0x28] sm:$0xff]  ;;  %v2137_v62 = vpack.c.bf16 %v955_v59, %v954_v57  ;;  %v956_v63 = vld [vmem:[%s3563_s7 + $0x20] sm:$0xff]  ;;  %v857_v4 = vld [vmem:[%s3561_s15 + $0x30] sm:$0xff]  ;;  %v1033_v35 = vstv %s1943_s6 }
 0x37a   : > { %2135 = vmatpush3.bf16.msra.mxu1 %v2134_v54  ;;  %2124 = vmatprep.subr.bf16.mxu0 %v2727_v53  ;;  %v957_v0 = vld [vmem:[%s3563_s7 + $0x28] sm:$0xff]  ;;  %v2128_v2 = vpack.c.bf16 %v856_v61, %v855_v60  ;;  %v858_v5 = vld [vmem:[%s3561_s15 + $0x38] sm:$0xff]  ;;  %v958_v6 = vld [vmem:[%s3563_s7 + $0x30] sm:$0xff]  ;;  %v1034_v37 = vadd.s32 %v1033_v35, %v1032_v34 }
 0x37b   : > { %2136 = vmatprep.subr.bf16.mxu1 %v2727_v53  ;;  %v2140_v3 = vpack.c.bf16 %v957_v0, %v956_v63  ;;  %v959_v7 = vld [vmem:[%s3563_s7 + $0x38] sm:$0xff]  ;;  %v2131_v8 = vpack.c.bf16 %v858_v5, %v857_v4  ;;  %v1940_v14 = vld [vmem:[%s3564_s17] ss:$0 sm:$0xff] }
 0x37c   : > { %v2143_v9 = vpack.c.bf16 %v959_v7, %v958_v6  ;;  %v1287_v41 = vld [vmem:[#allocation2 + $0x18] sm:$0xff]  ;;  %v1136_v63 = vld [vmem:[#allocation3] sm:$0xff] }
 0x37d   : > { %2126 = vmatpush3.bf16.msra.mxu0 %v2125_v58 }
 0x37e   : > { %2138 = vmatpush3.bf16.msra.mxu1 %v2137_v62  ;;  %2127 = vmatprep.subr.bf16.mxu0 %v2727_v53  ;;  %v1137_v62 = vld [vmem:[#allocation3 + $0x8] sm:$0xff] }
 0x37f   : > { %2139 = vmatprep.subr.bf16.mxu1 %v2727_v53 }
 0x381   : > { %2129 = vmatpush3.bf16.msra.mxu0 %v2128_v2 }
 0x382   : > { %2141 = vmatpush3.bf16.msra.mxu1 %v2140_v3  ;;  %2130 = vmatprep.subr.bf16.mxu0 %v2727_v53 }
 0x383   : > { %2142 = vmatprep.subr.bf16.mxu1 %v2727_v53 }
 0x385   : > { %2132 = vmatpush3.bf16.msra.mxu0 %v2131_v8 }
 0x386   : > { %2144 = vmatpush3.bf16.msra.mxu1 %v2143_v9  ;;  %v1373_v9 = vld [vmem:[#allocation3 + $0x10] sm:$0xff] }
 0x401   : > { %v838_v10 = vpop.xlane.xlu0 %837 }
 0x402   : > { %v840_v11 = vmul.f32 0.015625, %v838_v10 }
 0x404   : > { %v841_v12 = vadd.f32 1e-05, %v840_v11 }
 0x406   : > { %2355 = vrsqrt.f32 %v841_v12 }
 0x410   : > { %v2356_v13 = vpop.eup %2355 }
 0x411   : > { %v843_v15 = vmul.f32 %v2356_v13, %v832_v45  ;;  %v1374_v13 = vld [vmem:[#allocation3 + $0x18] sm:$0xff] }
 0x413   : > { %v850_v16 = vmul.f32 %v1940_v14, %v843_v15 }
 0x415   : > { %2049 = vmatmul.mubr.msk.f32.vlgmr.msra.gmra.mrb[0].mxu0 %vm835_vm10, %v850_v16  ;;  %2068 = vmatmul.mubr.msk.f32.vlgmr.msra.gmra.mrb[0].mxu1 %vm835_vm10, %v850_v16 }
 0x416   : > { %2072 = vmatprep.mubr.msk.f32.mxu0 %vm945_vm12, %v1050_v17 }
 0x4e8   : > { %v928_v18 = vpop.f32.mrb[0].mxu0  ;;  %v3308_v19 = vpop.f32.mrb[0].mxu1 }
 0x4e9   : > { %v934_v20 = vsub.f32 0.0, %v928_v18  ;;  %v2069_v21 = vpop.f32.mrb[1].mxu1  ;;  %2075 = vmatprep.subr.mxu1 %v3308_v19  ;;  %940 = vrot.lane.b32.xlu1 %v928_v18, %s2730_s26  ;;  %v2050_v22 = vpop.f32.mrb[1].mxu0  ;;  %v933_v32 = vmul.f32 %v932_v27, %v928_v18 }
 0x4ea   : > { %2076 = vmatpush3.msra.mxu1 %v3308_v19 }
 0x4eb   : > { %936 = vrot.lane.b32.xlu0 %v934_v20, %s2732_s11 }
 0x55b   : > { %v941_v24 = vpop.permute.xlu1 %940 }
 0x55d   : > { %v937_v25 = vpop.permute.xlu0 %936 }
 0x55e   : > { %v944_v29 = vsel %vm943_vm13, %v937_v25, %v941_v24 }
 0x55f   : > { %v946_v30 = vsel %vm945_vm12, %v944_v29, %v937_v25 }
 0x560   : > { %v948_v31 = vsel %vm947_vm14, %v946_v30, %v941_v24 }
 0x561   : > { %v950_v33 = vmul.f32 %v949_v28, %v948_v31 }
 0x563   : > { %v951_v36 = vadd.f32 %v950_v33, %v933_v32 }
 0x565   : > { %1288 = vrot.lane.b32.xlu1 %v951_v36, %s2733_s14  ;;  %2070 = vmatprep.subr.msk.mxu0 %vm945_vm12, %v951_v36 }
 0x566   : > { %2071 = vmatpush3.xpose.msk.msra.mxu0 %vm945_vm12, %v951_v36 }
 0x569   : > { %2073 = vmatmul.mubr.msk.f32.vlgmr.msra.gmra.mrb[2].mxu0 %vm945_vm12, %v1051_v38  ;;  %1041 = vperm.xlu1 %2353, %v1034_v37  }
 0x56a   : > { %2082 = vmatprep.mubr.msk.f32.mxu0 %vm945_vm12, %v1286_v39 }
 0x5d7   : > { %v1289_v40 = vpop.permute.xlu1 %1288 }
 0x5d8   : > { %2080 = vmatprep.subr.msk.mxu0 %vm945_vm12, %v1289_v40 }
 0x5d9   : > { %2081 = vmatpush3.xpose.msk.msra.mxu0 %vm945_vm12, %v1289_v40 }
 0x5dc   : > { %2083 = vmatmul.mubr.msk.f32.vlgmr.msra.gmra.mrb[4].mxu0 %vm945_vm12, %v1287_v41 }
 0x5e8   : > { %v1042_v45 = vpop.permute.xlu1 %1041 }
 0x5e9   : > { %v1044_v46 = vsub.s32 %v1042_v45, %v1039_v44  ;;  %vm1043_vm15 = vcmp.ge.s32.totalorder %v1042_v45, %v1039_v44 }
 0x5eb   : > { %vm1045_vm0 = vcmp.le.s32.totalorder %v1044_v46, 10 }
 0x5ec   : > { %vm3328_vm1 = vmand %vm1043_vm15, %vm1045_vm0 }
 0x5ed   : > { %v1047_v49 = vsel %vm3328_vm1, 0.0, %v2734_v48  ;;  %v1945_v27 = vsel %vm3328_vm1, 1.0, %v2729_v1  ;;  %v1171_v48 = vld [vmem:[#allocation4 + $0x8] sm:$0xff] }
 0x63c   : > { %v2074_v50 = vpop.f32.mrb[2].mxu0 }
 0x63d   : > { %v1133_v51 = vadd.f32 %v2074_v50, %v1047_v49  ;;  %v1127_v52 = vpop.f32.mrb[3].mxu0 }
 0x63e   : > { %v1128_v53 = vadd.f32 %v1127_v52, %v1047_v49 }
 0x63f   : > { %v1141_v54 = vsel %vm943_vm13, %v1133_v51, -inf }
 0x640   : > { %1142 = vmax.xlane.f32.xlu0 %v1141_v54  ;;  %v1138_v55 = vsel %vm943_vm13, %v1128_v53, -inf  ;;  %v1170_v54 = vld [vmem:[#allocation4] sm:$0xff] }
 0x641   : > { %1139 = vmax.xlane.f32.xlu1 %v1138_v55 }
 0x6af   : > { %v2084_v56 = vpop.f32.mrb[4].mxu0 }
 0x6b0   : > { %v1364_v57 = vpop.f32.mrb[5].mxu0  ;;  %v3336_v59 = vadd.f32 %v2084_v56, %v1047_v49 }
 0x6b1   : > { %v1365_v58 = vadd.f32 %v1364_v57, %v1047_v49 }
 0x6b2   : > { %v1378_v61 = vsel %vm943_vm13, %v3336_v59, -inf }
 0x6b3   : > { %v1375_v60 = vsel %vm943_vm13, %v1365_v58, -inf }
 0x6b4   : > { %1376 = vmax.xlane.f32.xlu1 %v1375_v60 }
 0x6b8   : > { %1379 = vmax.xlane.f32.xlu1 %v1378_v61 }
 0x6cd   : > { %v1143_v0 = vpop.xlane.xlu0 %1142 }
 0x6ce   : > { %v1145_v2 = vmax.f32 %v1137_v62, %v1143_v0  ;;  %v1140_v3 = vpop.xlane.xlu1 %1139 }
 0x6cf   : > { %v1144_v4 = vmax.f32 %v1136_v63, %v1140_v3  ;;  %v1407_v3 = vld [vmem:[#allocation4 + $0x10] sm:$0xff] }
 0x6d0   : > { %v1147_v5 = vsub.f32 %v1137_v62, %v1145_v2  ;;  %1285 = vst.msk [vmem:[#allocation3 + $0x8] sm:$0xff] %vm1182_vm2, %v1145_v2  ;;  %1159 = vperm.xlu0 %2354, %v1145_v2  }
 0x6d1   : > { %v1146_v6 = vsub.f32 %v1136_v63, %v1144_v4  ;;  %1284 = vst.msk [vmem:[#allocation3] sm:$0xff] %vm1182_vm2, %v1144_v4  ;;  %1154 = vperm.xlu1 %2353, %v1144_v4  }
 0x6d2   : > { %v1150_v7 = vmul.f32 1.442695, %v1147_v5 }
 0x6d3   : > { %v1148_v10 = vmul.f32 1.442695, %v1146_v6  ;;  %v1408_v6 = vld [vmem:[#allocation4 + $0x18] sm:$0xff] }
 0x6d4   : > { %2357 = vpow2.f32 %v1150_v7 }
 0x6d5   : > { %2359 = vpow2.f32 %v1148_v10 }
 0x6de   : > { %v3343_v8 = vpop.eup %2357 }
 0x6df   : > { %1194 = vperm.xlu0 %2354, %v3343_v8   ;;  %v2360_v18 = vpop.eup %2359  ;;  %v1173_v49 = vmul.f32 %v3343_v8, %v1171_v48 }
 0x6e0   : > { %v1172_v55 = vmul.f32 %v2360_v18, %v1170_v54 }
 0x741   : > { %v1377_v11 = vpop.xlane.xlu1 %1376 }
 0x742   : > { %v1381_v12 = vmax.f32 %v1373_v9, %v1377_v11  ;;  %v1422_v11 = vld [vmem:[#allocation5 + $0x18] sm:$0xff] }
 0x744   : > { %v1383_v14 = vsub.f32 %v1373_v9, %v1381_v12  ;;  %1524 = vst.msk [vmem:[#allocation3 + $0x10] sm:$0xff] %vm1182_vm2, %v1381_v12  ;;  %1391 = vperm.xlu1 %2353, %v1381_v12  }
 0x745   : > { %v1380_v15 = vpop.xlane.xlu1 %1379 }
 0x746   : > { %v1382_v16 = vmax.f32 %v1374_v13, %v1380_v15  ;;  %v1385_v43 = vmul.f32 1.442695, %v1383_v14 }
 0x748   : > { %v1384_v17 = vsub.f32 %v1374_v13, %v1382_v16  ;;  %1525 = vst.msk [vmem:[#allocation3 + $0x18] sm:$0xff] %vm1182_vm2, %v1382_v16  ;;  %1396 = vperm.xlu1 %2353, %v1382_v16   ;;  %v1421_v13 = vld [vmem:[#allocation5 + $0x10] sm:$0xff] }
 0x74a   : > { %v1387_v45 = vmul.f32 1.442695, %v1384_v17 }
 0x74c   : > { %1436 = vrot.lane.b32.xlu1 %v3308_v19, %s2733_s14 }
 0x74f   : > { %v1160_v20 = vpop.permute.xlu0 %1159 }
 0x750   : > { %v1163_v21 = vsub.f32 %v1133_v51, %v1160_v20  ;;  %1189 = vperm.xlu1 %2353, %v2360_v18   ;;  %v1155_v22 = vpop.permute.xlu1 %1154 }
 0x751   : > { %v1162_v23 = vsub.f32 %v1128_v53, %v1155_v22 }
 0x752   : > { %v1166_v24 = vmul.f32 1.442695, %v1163_v21 }
 0x753   : > { %v1164_v25 = vmul.f32 1.442695, %v1162_v23 }
 0x754   : > { %2361 = vpow2.f32 %v1166_v24 }
 0x755   : > { %2363 = vpow2.f32 %v1164_v25 }
 0x75e   : > { %v2362_v26 = vpop.eup %2361  ;;  %v1195_v47 = vpop.permute.xlu0 %1194 }
 0x75f   : > { %v2364_v28 = vpop.eup %2363  ;;  %v1169_v29 = vmul.f32 %v2362_v26, %v1945_v27 }
 0x760   : > { %v1168_v30 = vmul.f32 %v2364_v28, %v1945_v27 }
 0x761   : > { %v1177_v19 = vsel %vm943_vm13, %v1169_v29, 0.0 }
 0x762   : > { %1178 = vadd.xlane.f32.xlu0 %v1177_v19  ;;  %2077 = vmatprep.mubr.msk.f32.mxu1 %vm943_vm13, %v1168_v30  ;;  %v1174_v31 = vsel %vm943_vm13, %v1168_v30, 0.0 }
 0x763   : > { %2078 = vmatmul.mubr.msk.f32.vlgmr.msra.gmra.mrb[2].mxu1 %vm943_vm13, %v1169_v29 }
 0x774   : > { %1175 = vadd.xlane.f32.xlu1 %v1174_v31 }
 0x7c3   : > { %v1392_v32 = vpop.permute.xlu1 %1391 }
 0x7c4   : > { %v1399_v33 = vsub.f32 %v1365_v58, %v1392_v32  ;;  %v1186_v58 = vld [vmem:[#allocation5 + $0x8] sm:$0xff] }
 0x7c5   : > { %v1198_v60 = vmul.f32 %v1195_v47, %v1186_v58 }
 0x7c6   : > { %v1401_v34 = vmul.f32 1.442695, %v1399_v33 }
 0x7c7   : > { %v1397_v35 = vpop.permute.xlu1 %1396 }
 0x7c8   : > { %2365 = vpow2.f32 %v1401_v34  ;;  %v1400_v1 = vsub.f32 %v3336_v59, %v1397_v35  ;;  %v1185_v59 = vld [vmem:[#allocation5] sm:$0xff] }
 0x7ca   : > { %v1403_v36 = vmul.f32 1.442695, %v1400_v1 }
 0x7cb   : > { %v1437_v37 = vpop.permute.xlu1 %1436 }
 0x7cc   : > { %2367 = vpow2.f32 %v1403_v36  ;;  %2085 = vmatprep.subr.mxu1 %v1437_v37 }
 0x7cd   : > { %2086 = vmatpush3.msra.mxu1 %v1437_v37  ;;  %2369 = vpow2.f32 %v1385_v43 }
 0x7ce   : > { %2371 = vpow2.f32 %v1387_v45 }
 0x7cf   : > { %v1190_v53 = vpop.permute.xlu1 %1189 }
 0x7d0   : > { %v1197_v61 = vmul.f32 %v1190_v53, %v1185_v59 }
 0x7d2   : > { %v2366_v38 = vpop.eup %2365 }
 0x7d3   : > { %v1405_v39 = vmul.f32 %v2366_v38, %v1945_v27 }
 0x7d5   : > { %2087 = vmatprep.mubr.msk.f32.mxu1 %vm943_vm13, %v1405_v39  ;;  %v1411_v40 = vsel %vm943_vm13, %v1405_v39, 0.0 }
 0x7d6   : > { %v2368_v41 = vpop.eup %2367  ;;  %1412 = vadd.xlane.f32.xlu1 %v1411_v40 }
 0x7d7   : > { %v1406_v42 = vmul.f32 %v2368_v41, %v1945_v27  ;;  %v2370_v46 = vpop.eup %2369 }
 0x7d8   : > { %v2372_v50 = vpop.eup %2371  ;;  %v1409_v4 = vmul.f32 %v2370_v46, %v1407_v3 }
 0x7d9   : > { %2088 = vmatmul.mubr.msk.f32.vlgmr.msra.gmra.mrb[4].mxu1 %vm943_vm13, %v1406_v42  ;;  %v1414_v44 = vsel %vm943_vm13, %v1406_v42, 0.0  ;;  %v1410_v8 = vmul.f32 %v2372_v50, %v1408_v6 }
 0x7da   : > { %1415 = vadd.xlane.f32.xlu0 %v1414_v44 }
 0x7e7   : > { %1425 = vperm.xlu1 %2353, %v2370_v46  }
 0x7ef   : > { %v1179_v51 = vpop.xlane.xlu0 %1178 }
 0x7f0   : > { %v1181_v52 = vadd.f32 %v1179_v51, %v1173_v49  ;;  %1430 = vperm.xlu0 %2354, %v2372_v50  }
 0x7f2   : > { %1184 = vst.msk [vmem:[#allocation4 + $0x8] sm:$0xff] %vm1182_vm2, %v1181_v52 }
 0x801   : > { %v1176_v56 = vpop.xlane.xlu1 %1175 }
 0x802   : > { %v1180_v57 = vadd.f32 %v1176_v56, %v1172_v55 }
 0x804   : > { %1183 = vst.msk [vmem:[#allocation4] sm:$0xff] %vm1182_vm2, %v1180_v57 }
 0x836   : > { %v2079_v62 = vpop.f32.mrb[2].mxu1 }
 0x837   : > { %v1281_v63 = vadd.f32 %v2079_v62, %v1198_v60  ;;  %v1271_v0 = vpop.f32.mrb[3].mxu1 }
 0x838   : > { %v1280_v2 = vadd.f32 %v1271_v0, %v1197_v61 }
 0x839   : > { %1283 = vst.msk [vmem:[#allocation5 + $0x8] sm:$0xff] %vm945_vm12, %v1281_v63 }
 0x83a   : > { %1282 = vst.msk [vmem:[#allocation5] sm:$0xff] %vm945_vm12, %v1280_v2 }
 0x863   : > { %v1413_v5 = vpop.xlane.xlu1 %1412 }
 0x864   : > { %v1417_v7 = vadd.f32 %v1413_v5, %v1409_v4 }
 0x866   : > { %1419 = vst.msk [vmem:[#allocation4 + $0x10] sm:$0xff] %vm1182_vm2, %v1417_v7 }
 0x867   : > { %v1416_v9 = vpop.xlane.xlu0 %1415  ;;  %v1426_v14 = vpop.permute.xlu1 %1425 }
 0x868   : > { %v1418_v10 = vadd.f32 %v1416_v9, %v1410_v8  ;;  %v1433_v16 = vmul.f32 %v1426_v14, %v1421_v13 }
 0x86a   : > { %1420 = vst.msk [vmem:[#allocation4 + $0x18] sm:$0xff] %vm1182_vm2, %v1418_v10 }
 0x86f   : > { %v1431_v12 = vpop.permute.xlu0 %1430 }
 0x870   : > { %v1434_v15 = vmul.f32 %v1431_v12, %v1422_v11 }
 0x8ac   : > { %v2089_v17 = vpop.f32.mrb[4].mxu1 }
 0x8ad   : > { %v1521_v18 = vadd.f32 %v2089_v17, %v1434_v15  ;;  %v1511_v20 = vpop.f32.mrb[5].mxu1 }
 0x8ae   : > { %v1520_v21 = vadd.f32 %v1511_v20, %v1433_v16 }
 0x8af   : > { %1523 = vst.msk [vmem:[#allocation5 + $0x18] sm:$0xff] %vm945_vm12, %v1521_v18 }
 0x8b0   : > { %1522 = vst.msk [vmem:[#allocation5 + $0x10] sm:$0xff] %vm945_vm12, %v1520_v21 }
 0x8b1 PF: > { %s3570_s10 = sld [smem:[#allocation24_spill]] }
 0x8b7   : > { %p1956_p6 = scmp.ne.s32.totalorder %s3570_s10, 2 }
 0x8b8   : > { %v1531_v22 = vld [vmem:[#allocation4 + $0x8] sm:$0xff] (!%p1956_p6)  ;;  %v1533_v23 = vld [vmem:[#allocation4 + $0x18] sm:$0xff] (!%p1956_p6)  ;;  %v1532_v24 = vld [vmem:[#allocation4 + $0x10] sm:$0xff] (!%p1956_p6)  ;;  %v2735_v25 = vmov (!%p1956_p6), 0   ;;  %v2736_v44 = vmov (!%p1956_p6), 0.0|0.0   ;;  %vm2737_vm3 = vmmov (!%p1956_p6), 0  }
 0x8b9   : > { %1529 = sbr.rel (%p1956_p6) target bundleno = 2716 (0xa9c), region = 96  ;;  %2373 = vset.pattern.permute.xlu0 (!%p1956_p6), %v2735_v25  ;;  %2374 = vset.pattern.permute.xlu1 (!%p1956_p6), %v2735_v25  ;;  %2375 = vrcp.f32 (!%p1956_p6), %v1531_v22  ;;  %v1530_v26 = vld [vmem:[#allocation4] sm:$0xff] (!%p1956_p6)  ;;  %v1597_v42 = vld [vmem:[#allocation14 + $0x8] sm:$0xff] (!%p1956_p6)  ;;  %v1598_v43 = vld [vmem:[#allocation14 + $0x10] sm:$0xff] (!%p1956_p6)  ;;  %v2738_v54 = vmov (!%p1956_p6), 0.0   ;;  %s2739_s30 = smov (!%p1956_p6), 16  }
 0x8ba   : > { %2377 = vrcp.f32 (!%p1956_p6), %v1533_v23  ;;  %v1596_v41 = vld [vmem:[#allocation14] sm:$0xff] (!%p1956_p6)  ;;  %2145 = vmatprep.subr.bf16.mxu0 (!%p1956_p6), %v2736_v44  ;;  %v1599_v46 = vld [vmem:[#allocation14 + $0x18] sm:$0xff] (!%p1956_p6)  ;;  %v1601_v49 = vld [vmem:[#allocation14 + $0x28] sm:$0xff] (!%p1956_p6)  ;;  %2106 = vmatprep.mubr.msk.f32.mxu0 (!%p1956_p6), %vm2737_vm3, %v2738_v54  ;;  %s2740_s20 = smov (!%p1956_p6), 32   ;;  %s2741_s18 = smov (!%p1956_p6), 48   ;;  %vm1590_vm4 = vcmask (!%p1956_p6), 130048  }
 0x8bb   : > { %2379 = vrcp.f32 (!%p1956_p6), %v1532_v24  ;;  %v2146_v45 = vpack.c.bf16 (!%p1956_p6), %v1597_v42, %v1596_v41  ;;  %v2149_v47 = vpack.c.bf16 (!%p1956_p6), %v1599_v46, %v1598_v43  ;;  %v1600_v48 = vld [vmem:[#allocation14 + $0x20] sm:$0xff] (!%p1956_p6)  ;;  %v1602_v51 = vld [vmem:[#allocation14 + $0x30] sm:$0xff] (!%p1956_p6)  ;;  %v1603_v52 = vld [vmem:[#allocation14 + $0x38] sm:$0xff] (!%p1956_p6)  ;;  %vm1592_vm5 = vcmask (!%p1956_p6), 261120  }
 0x8bc   : > { %2381 = vrcp.f32 (!%p1956_p6), %v1530_v26  ;;  %v2152_v50 = vpack.c.bf16 (!%p1956_p6), %v1601_v49, %v1600_v48  ;;  %v2155_v53 = vpack.c.bf16 (!%p1956_p6), %v1603_v52, %v1602_v51  ;;  %v1551_v55 = vld [vmem:[#allocation5 + $0x8] sm:$0xff] (!%p1956_p6)  ;;  %v1553_v57 = vld [vmem:[#allocation5 + $0x18] sm:$0xff] (!%p1956_p6)  ;;  %v1552_v60 = vld [vmem:[#allocation5 + $0x10] sm:$0xff] (!%p1956_p6)  ;;  %vm1594_vm6 = vcmask (!%p1956_p6), 392192  }
 0x8bd   : > { %2147 = vmatpush3.bf16.msra.mxu0 (!%p1956_p6), %v2146_v45  ;;  %v1550_v0 = vld [vmem:[#allocation5] sm:$0xff] (!%p1956_p6)  ;;  %vm1604_vm7 = vcmask (!%p1956_p6), 523264  }
 0x8be   : > { %2148 = vmatprep.subr.bf16.mxu0 (!%p1956_p6), %v2736_v44  ;;  %v1678_v10 = vld [vmem:[%s3196_s28] sm:$0xff] (!%p1956_p6) }
 0x8c1   : > { %2150 = vmatpush3.bf16.msra.mxu0 %v2149_v47 }
 0x8c2   : > { %2151 = vmatprep.subr.bf16.mxu0 %v2736_v44 }
 0x8c3   : > { %v2376_v27 = vpop.eup %2375 }
 0x8c4   : > { %v2378_v28 = vpop.eup %2377  ;;  %v1539_v29 = vmul.f32 %v2376_v27, %v1531_v22 }
 0x8c5   : > { %v2380_v30 = vpop.eup %2379  ;;  %v1541_v19 = vmul.f32 %v2378_v28, %v1533_v23  ;;  %2153 = vmatpush3.bf16.msra.mxu0 %v2152_v50 }
 0x8c6   : > { %v2382_v31 = vpop.eup %2381  ;;  %v1543_v32 = vsub.f32 2.0, %v1539_v29  ;;  %v1540_v33 = vmul.f32 %v2380_v30, %v1532_v24  ;;  %2154 = vmatprep.subr.bf16.mxu0 %v2736_v44 }
 0x8c7   : > { %v1545_v34 = vsub.f32 2.0, %v1541_v19  ;;  %v1538_v35 = vmul.f32 %v2382_v31, %v1530_v26 }
 0x8c8   : > { %v1547_v1 = vmul.f32 %v2376_v27, %v1543_v32  ;;  %v1544_v36 = vsub.f32 2.0, %v1540_v33 }
 0x8c9   : > { %v1549_v37 = vmul.f32 %v2378_v28, %v1545_v34  ;;  %v1542_v38 = vsub.f32 2.0, %v1538_v35  ;;  %2156 = vmatpush3.bf16.msra.mxu0 %v2155_v53 }
 0x8ca   : > { %1561 = vperm.xlu0 %2373, %v1547_v1   ;;  %v1548_v39 = vmul.f32 %v2380_v30, %v1544_v36 }
 0x8cb   : > { %1571 = vperm.xlu1 %2374, %v1549_v37   ;;  %v1546_v40 = vmul.f32 %v2382_v31, %v1542_v38 }
 0x8ce   : > { %1566 = vperm.xlu0 %2373, %v1548_v39  }
 0x8cf   : > { %1556 = vperm.xlu1 %2374, %v1546_v40  }
 0x949   : > { %v1562_v56 = vpop.permute.xlu0 %1561 }
 0x94a   : > { %v1575_v58 = vmul.f32 %v1562_v56, %v1551_v55  ;;  %v1572_v59 = vpop.permute.xlu1 %1571 }
 0x94b   : > { %v1577_v61 = vmul.f32 %v1572_v59, %v1553_v57 }
 0x94c   : > { %1579 = vrot.lane.b32.xlu0 %v1575_v58, %s2739_s30 }
 0x94d   : > { %v1567_v62 = vpop.permute.xlu0 %1566 }
 0x94e   : > { %v1576_v63 = vmul.f32 %v1567_v62, %v1552_v60  ;;  %v1557_v2 = vpop.permute.xlu1 %1556 }
 0x94f   : > { %v1574_v4 = vmul.f32 %v1557_v2, %v1550_v0 }
 0x950   : > { %1583 = vrot.lane.b32.xlu1 %v1576_v63, %s2740_s20  ;;  %1587 = vrot.lane.b32.xlu0 %v1577_v61, %s2741_s18 }
 0x9be   : > { %v1580_v3 = vpop.permute.xlu0 %1579 }
 0x9bf   : > { %v1591_v5 = vsel %vm1590_vm4, %v1574_v4, %v1580_v3 }
 0x9c2   : > { %v1584_v6 = vpop.permute.xlu1 %1583  ;;  %v1588_v7 = vpop.permute.xlu0 %1587 }
 0x9c3   : > { %v1593_v8 = vsel %vm1592_vm5, %v1591_v5, %v1584_v6 }
 0x9c4   : > { %v1595_v9 = vsel %vm1594_vm6, %v1593_v8, %v1588_v7 }
 0x9c5   : > { %2107 = vmatmul.mubr.msk.f32.vlgmr.msra.gmra.mrb[0].mxu0 %vm1604_vm7, %v1595_v9 }
 0xa98   : > { %v1674_v11 = vpop.f32.mrb[0].mxu0 }
 0xa99   : > { %v1679_v12 = vadd.f32 %v1678_v10, %v1674_v11  ;;  %v2108_v13 = vpop.f32.mrb[1].mxu0 }
 0xa9b   : > { %1680 = vst.msk [vmem:[%s634_s5] sm:$0xff] %vm1604_vm7, %v1679_v12 }
 0xa9c PF: > { %s3571_s3 = sld [smem:[#allocation26_spill]]  ;;  %s3572_s4 = sld [smem:[#allocation25_spill]] }
 0xa9d   : > { %s3573_s17 = sld [smem:[#allocation23_spill]]  ;;  %s3574_s26 = sld [smem:[#allocation29_spill]] }
 0xa9e   : > { %s1697_s1 = sshll.u32 %s634_s5, 4  ;;  %s3575_s14 = sld [smem:[#allocation45_spill]]  ;;  %s3379_s1 = int_to_ptr.vmem [resolvable:$true] %s1697_s1 }
 0xa9f   : > { %s2531_s20 = scalar_lea.vmem %s3379_s1, 128  ;;  %s2742_s18 = smov [#allocation15]  }
 0xaa0   : > { %p2532_p5 = scmp.ne.s32.totalorder %s3379_s1, %s2531_s20  ;;  %s2535_s16 = sshll.u32 %s2742_s18, 4  ;;  %s2536_s16 = int_to_ptr.vmem [resolvable:$false] %s2535_s16 }
 0xaa1   : > { %s2537_s5 = scalar_lea.vmem %s2536_s16, 256  ;;  %p2538_p9 = scmp.lt.s32.totalorder %s3379_s1, %s2536_s16 }
 0xaa2   : > { %s1959_s23 = sshll.u32 %s3571_s3, 2  ;;  %p2539_p8 = scmp.lt.s32.totalorder %s2537_s5, %s2531_s20 }
 0xaa3   : > { %s1693_s11 = sadd.s32 %s3572_s4, %s1959_s23  ;;  %s3576_s10 = sand.u32 1, %s3573_s17  }
 0xaa4   : > { %s1960_s12 = sshll.u32 %s1693_s11, 7  ;;  %s1682_s30 = scalar_lea.sflag [#allocation8], %s3576_s10 }
 0xaa5   : > { %s1695_s2 = scalar_lea.hbm %s3575_s14, %s1960_s12  ;;  %p3577_p13 = scmp.ne.s32.totalorder %s3574_s26, 0 }
 0xaa6   : > { %p2540_p12 = por %p2539_p8, %p2538_p9 }
 0xaa7   : > { %p2533_p11 = pnand %p2532_p5, %p3577_p13 }
 0xaa9   : > { %p2534_p4 = pneg %p2533_p11 }
 0xaab   : > { %p2541_p3 = pnand %p2540_p12, %p2534_p4 }
 0xaad   : > { %2544 = shalt.err (!%p2541_p3)
}
 0xaae   : > { %s2545_s3 = scalar_lea.hbm %s1695_s2, 128  ;;  %s2549_s23 = scalar_lea.hbm %s3575_s14, 1024 }
 0xaaf   : > { %p2546_p7 = scmp.ne.s32.totalorder %s1695_s2, %s2545_s3  ;;  %p2550_p10 = scmp.lt.u32.totalorder %s1695_s2, %s3575_s14 }
 0xab0   : > { %p2551_p1 = scmp.lt.u32.totalorder %s2549_s23, %s2545_s3  ;;  %p2553_p5 = scmp.lt.u32.totalorder %s2545_s3, %s1695_s2 }
 0xab1   : > { %p2547_p0 = pnand %p2546_p7, %p3577_p13 }
 0xab2   : > { %p2552_p6 = por %p2551_p1, %p2550_p10 }
 0xab3   : > { %p2548_p2 = pneg %p2547_p0 }
 0xab4   : > { %p2554_p11 = por %p2553_p5, %p2552_p6 }
 0xab6   : > { %p2555_p4 = pnand %p2554_p11, %p2548_p2 }
 0xab8   : > { %2558 = shalt.err (!%p2555_p4)
}
 0xab9   : > { %2169 = dma.vmem_to_hbm [thread:$0]  (%p3577_p13), %s3379_s1, 128, %s1695_s2, %s1682_s30  }
 0xaba PF: > { %s3578_s6 = sld [smem:[#allocation22_spill]]  ;;  %s3579_s28 = sld [smem:[#allocation30_spill]] }
 0xabb   : > { %p2195_p9 = scmp.ge.s32.totalorder %s2709_s13, 2 }
 0xac0   : > { %s1709_s10 = sand.u32 1, %s3578_s6   ;;  %p3580_p8 = scmp.ne.s32.totalorder %s3579_s28, 0 }
 0xac1   : > { %s1710_s20 = scalar_lea.sflag [#allocation8], %s1709_s10 }
 0xac2   : > { %p2189_p12 = pnand %p2195_p9, %p3580_p8 }
 0xac4   : > { %2644 = dma.done.wait (!%p2189_p12), %s1710_s20, 128  }
 0xac5   : > { %2646 = vsyncadd (!%p2189_p12), %s1710_s20, 4294967168  ;;  %s33_s13 = sadd.s32 1, %s2709_s13   ;;  %s3582_s17 = sld [smem:[#allocation23_spill]] }
 0xac6   : > { %p3407_p3 = scmp.ge.s32.totalorder %s33_s13, 26   ;;  %s3583_s1 = sld [smem:[#allocation27_spill]] }
 0xac7   : > { %s3584_s28 = sld [smem:[#allocation28_spill]]  ;;  %s3585_s2 = sld [smem:[#allocation31_spill]] }
 0xac8   : > { %s3586_s30 = sld [smem:[#allocation32_spill]]  ;;  %s3587_s12 = sld [smem:[#allocation33_spill]] }
 0xac9   : > { %s3589_s18 = smov %s2657_s19  ;;  %s3590_s19 = smov %s3083_s27 }
 0xaca   : > { %s3591_s20 = smov %s2665_s21  ;;  %s3592_s21 = smov %s2669_s22 }
 0xacb   : > { %s3593_s22 = smov %s3088_s8  ;;  %s3594_s23 = smov %s2677_s24 }
 0xacc   : > { %s3595_s24 = smov %s2681_s25  ;;  %s3596_s25 = smov %s3064_s9 }
 0xacd   : > { %s3597_s26 = smov %s2697_s29  ;;  %s3598_s27 = smov %s3583_s1 }
 0xace   : > { %s3599_s29 = smov %s3585_s2  ;;  %32 = sbr.rel (!%p3407_p3) target bundleno = 28 (0x1c), region = 168 }
 0xad5   :  { %1715 = vsyncpa [#allocation7], 1 }
 0xad6   :  { %1717 = vsyncpa [#allocation7 + $0x1], 1 }
 0xad7   :  { %1718 = vsyncpa [#allocation10], 1 }
 0xad8   :  { %1720 = vsyncpa [#allocation10 + $0x1], 1 }
 0xad9   :  { %1721 = vsyncpa [#allocation13], 1 }
 0xada   :  { %1723 = vsyncpa [#allocation13 + $0x1], 1 }
 0xadb   :  { %1724 = vsyncpa [#allocation8], 1 }
 0xadc   :  { %1726 = vsyncpa [#allocation8 + $0x1], 1 }

</bundles_post_ra>
